<compile_context>
chip_gen: v7x
topology: tpu7x:2x2x1
jax: 0.10.0
libtpu: 0.0.40
codegen_flags: <defaults>
</compile_context>

<pallas_src>
import functools
import math

import jax
import jax.numpy as jnp
from jax import lax
from jax.experimental import pallas as pl
from jax.experimental.pallas import tpu as pltpu

# Set to jnp.bfloat16 on v6e/v7x for higher MXU throughput (loosen the parity
# tolerance in __main__ accordingly).  v5e keeps its VPU path in f32 either way.
MATMUL_DTYPE = jnp.float32


def _round_up(x, m):
    return ((x + m - 1) // m) * m


def _pad_last(a, target):
    pad = target - a.shape[-1]
    if pad == 0:
        return a
    return jnp.pad(a, [(0, 0)] * (a.ndim - 1) + [(0, pad)])


# ---------------------------------------------------------------------------
# Fused Block kernel: head MBConv (stride 2) + num_stack MBConvs (stride 1),
# one image per grid step.  All intermediates stay in VMEM.
# ---------------------------------------------------------------------------
def _block_kernel(xh_ref, we0_ref, wd0_ref, wp0_ref, wes_ref, wds_ref, wps_ref,
                  b_ref, o_ref, mid_ref, *, Ho, Wo, Cout, num_stack):
    f32 = jnp.float32
    Cmp = we0_ref.shape[-1]
    HW = Ho * Wo
    L, R = Wo - 1, 2 * Wo          # halo column indices (left / right of interior)

    def mm(a, b):                  # MXU matmul, f32 accumulate
        return jnp.dot(a.astype(MATMUL_DTYPE), b.astype(MATMUL_DTYPE),
                       preferred_element_type=f32)

    # Zero ONLY the halo cells that are ever read (the interior is fully
    # rewritten by every layer).  Done every step so it is megacore-safe.
    mid_ref[0:1, :, :] = jnp.zeros((1, 3 * Wo, Cmp), f32)
    mid_ref[Ho + 1:Ho + 2, :, :] = jnp.zeros((1, 3 * Wo, Cmp), f32)
    mid_ref[1:Ho + 1, L:L + 1, :] = jnp.zeros((Ho, 1, Cmp), f32)
    mid_ref[1:Ho + 1, R:R + 1, :] = jnp.zeros((Ho, 1, Cmp), f32)

    def put(p):                    # aligned interior write: rows 1..Ho, cols Wo..2Wo-1
        mid_ref[1:Ho + 1, Wo:2 * Wo, :] = p

    def win(r0, c0):               # (Ho, Wo, Cmp) window read
        return mid_ref[r0:r0 + Ho, c0:c0 + Wo, :]

    def bias(row):                 # (1, Cmp) folded-BN bias
        return b_ref[row:row + 1, :]

    # ===================== head MBConv (stride 2) =====================
    # Wrapper pre-arranged the input phase-major:
    #   xh[(2*py+px)*HW + a*Wo + b, :] = x[2a+py, 2b+px, :]
    # so the stride-2 subsample is contiguous slices (no strided gathers).
    xh = xh_ref[...]
    h = jnp.clip(mm(xh, we0_ref[...]) + bias(0), 0.0, 6.0)        # (4*HW, Cmp)

    def phase(py, px):
        p = 2 * py + px
        return h[p * HW:(p + 1) * HW, :].reshape(Ho, Wo, Cmp)

    def w0(k):                     # head depthwise tap (k = ky*3 + kx)
        return wd0_ref[k:k + 1, :].reshape(1, 1, Cmp)

    ee, eo, oe, oo = phase(0, 0), phase(0, 1), phase(1, 0), phase(1, 1)
    # un-shifted taps come straight from the phase planes
    acc = ee * w0(4) + eo * w0(5) + oe * w0(7) + oo * w0(8)
    # shifted taps: aligned interior write, offset window reads against zero halo
    put(eo)
    acc = acc + win(1, L) * w0(3)                  # eo[a, b-1]    -> (ky,kx)=(1,0)
    put(oe)
    acc = acc + win(0, Wo) * w0(1)                 # oe[a-1, b]    -> (0,1)
    put(oo)
    acc = acc + win(1, L) * w0(6)                  # oo[a, b-1]    -> (2,0)
    acc = acc + win(0, Wo) * w0(2)                 # oo[a-1, b]    -> (0,2)
    acc = acc + win(0, L) * w0(0)                  # oo[a-1, b-1]  -> (0,0)

    y = jnp.clip(acc.reshape(HW, Cmp) + bias(1), 0.0, 6.0)
    act = mm(y, wp0_ref[...]) + b_ref[2:3, :Cout]                 # (HW, Cout)
    # act stays in VMEM -- the inter-layer activation never hits HBM.

    # ============== stack MBConvs (stride 1, residual) ==============
    for l in range(num_stack):
        r = 3 * (l + 1)
        he = jnp.clip(mm(act, wes_ref[l, :, :]) + bias(r), 0.0, 6.0)   # (HW, Cmp)
        put(he.reshape(Ho, Wo, Cmp))
        acc = jnp.zeros((Ho, Wo, Cmp), f32)
        for kx in range(3):
            # hoisted W-shifted window: one offset read per kx, reused over ky
            wcol = mid_ref[0:Ho + 2, L + kx:L + kx + Wo, :]            # (Ho+2, Wo, Cmp)
            for ky in range(3):
                k = ky * 3 + kx
                tap = wds_ref[l, k:k + 1, :].reshape(1, 1, Cmp)
                acc = acc + wcol[ky:ky + Ho] * tap
        yd = jnp.clip(acc.reshape(HW, Cmp) + bias(r + 1), 0.0, 6.0)
        act = act + mm(yd, wps_ref[l, :, :]) + b_ref[r + 2:r + 3, :Cout]

    o_ref[...] = act.reshape(Ho, Wo, Cout).astype(o_ref.dtype)


# ---------------------------------------------------------------------------
# Host-side param prep (BN-scale folding + lane-dense channel padding)
# ---------------------------------------------------------------------------
def _prep_layer(p, cmp_target):
    """Fold BN scales into conv weights; zero-pad expanded channels to cmp_target."""
    w_exp = _pad_last(p["w_exp"] * p["s_exp"][None, :], cmp_target)
    w_dw = _pad_last(p["w_dw"] * p["s_dw"][None, :], cmp_target)
    w_proj = p["w_proj"] * p["s_proj"][None, :]
    w_proj = jnp.pad(w_proj, ((0, cmp_target - w_proj.shape[0]), (0, 0)))
    b = jnp.concatenate([
        _pad_last(p["b_exp"][None, :], cmp_target),
        _pad_last(p["b_dw"][None, :], cmp_target),
        _pad_last(p["b_proj"][None, :], cmp_target),
    ], axis=0)                                            # (3, Cmp)
    return w_exp, w_dw, w_proj, b


def block_forward(x_nchw, params, stride):
    """Fused Block forward (head + all stack MBConvs in a single pallas_call)."""
    assert stride == 2, "fused kernel instantiates the stride-2 head"
    # TODO(synk): add a stride-1 head variant (treat the head like a stack layer).
    x = jnp.transpose(x_nchw, (0, 2, 3, 1)).astype(jnp.float32)    # NCHW -> NHWC
    N, H, W, Cin = x.shape
    Ho, Wo = H // stride, W // stride
    assert Ho == Wo and Wo % 8 == 0, "instantiated for 8-aligned square outputs"
    num_stack = len(params["stack"])
    Cout = params["head"]["w_proj"].shape[1]
    Cmp = _round_up(max(params["head"]["w_exp"].shape[1],
                        *[p["w_exp"].shape[1] for p in params["stack"]]), 128)

    we0, wd0, wp0, b0 = _prep_layer(params["head"], Cmp)
    sp = [_prep_layer(p, Cmp) for p in params["stack"]]
    wes = jnp.stack([s[0] for s in sp])                   # (num_stack, Cout, Cmp)
    wds = jnp.stack([s[1] for s in sp])                   # (num_stack, 9, Cmp)
    wps = jnp.stack([s[2] for s in sp])                   # (num_stack, Cmp, Cout)
    b_all = jnp.concatenate([b0] + [s[3] for s in sp], axis=0)     # (3*(1+ns), Cmp)

    # Phase-major head input: x[n, 2a+py, 2b+px, c] -> row (2py+px)*Ho*Wo + a*Wo + b.
    xh = (x.reshape(N, Ho, 2, Wo, 2, Cin)
            .transpose(0, 2, 4, 1, 3, 5)
            .reshape(N, 4 * Ho * Wo, Cin))

    kernel = functools.partial(_block_kernel, Ho=Ho, Wo=Wo, Cout=Cout,
                               num_stack=num_stack)
    nb = 3 * (1 + num_stack)
    out = pl.pallas_call(
        kernel,
        out_shape=jax.ShapeDtypeStruct((N, Ho, Wo, Cout), x.dtype),
        grid=(N,),
        in_specs=[
            pl.BlockSpec((None, 4 * Ho * Wo, Cin), lambda n: (n, 0, 0)),
            pl.BlockSpec((Cin, Cmp), lambda n: (0, 0)),
            pl.BlockSpec((9, Cmp), lambda n: (0, 0)),
            pl.BlockSpec((Cmp, Cout), lambda n: (0, 0)),
            pl.BlockSpec((num_stack, Cout, Cmp), lambda n: (0, 0, 0)),
            pl.BlockSpec((num_stack, 9, Cmp), lambda n: (0, 0, 0)),
            pl.BlockSpec((num_stack, Cmp, Cout), lambda n: (0, 0, 0)),
            pl.BlockSpec((nb, Cmp), lambda n: (0, 0)),
        ],
        out_specs=pl.BlockSpec((None, Ho, Wo, Cout), lambda n: (n, 0, 0, 0)),
        scratch_shapes=[pltpu.VMEM((Ho + 2, 3 * Wo, Cmp), jnp.float32)],
        compiler_params=pltpu.CompilerParams(
            dimension_semantics=("parallel",)),   # batch sharded across TCs (v7x)
    )(xh, we0, wd0, wp0, wes, wds, wps, b_all)
    return jnp.transpose(out, (0, 3, 1, 2))               # NHWC -> NCHW


# ---------------------------------------------------------------------------
# Parameters (deterministic synthetic init, folded inference BN)
# ---------------------------------------------------------------------------
def _fold_bn(gamma, beta, mean, var, eps=1e-5):
    scale = gamma / jnp.sqrt(var + eps)
    bias = beta - mean * scale
    return scale, bias


def _init_bn(key, c):
    k1, k2, k3, k4 = jax.random.split(key, 4)
    gamma = 1.0 + 0.1 * jax.random.normal(k1, (c,), jnp.float32)
    beta = 0.1 * jax.random.normal(k2, (c,), jnp.float32)
    mean = 0.05 * jax.random.normal(k3, (c,), jnp.float32)
    var = 1.0 + 0.1 * jax.random.uniform(k4, (c,), jnp.float32)
    return _fold_bn(gamma, beta, mean, var)


def _init_mbconv(key, cin, cout, expand):
    cmid = cin * expand
    ks = jax.random.split(key, 6)
    s_exp, b_exp = _init_bn(ks[1], cmid)
    s_dw, b_dw = _init_bn(ks[3], cmid)
    s_proj, b_proj = _init_bn(ks[5], cout)
    return dict(
        w_exp=jax.random.normal(ks[0], (cin, cmid), jnp.float32) / math.sqrt(cin),
        s_exp=s_exp, b_exp=b_exp,
        w_dw=jax.random.normal(ks[2], (9, cmid), jnp.float32) / 3.0,  # 3x3 taps flat
        s_dw=s_dw, b_dw=b_dw,
        w_proj=jax.random.normal(ks[4], (cmid, cout), jnp.float32) / math.sqrt(cmid),
        s_proj=s_proj, b_proj=b_proj,
    )


def init_block_params(key, in_ch, block_ch, num_stack, expand):
    keys = jax.random.split(key, 1 + num_stack)
    return dict(
        head=_init_mbconv(keys[0], in_ch, block_ch, expand),
        stack=[_init_mbconv(k, block_ch, block_ch, expand) for k in keys[1:]],
    )


# ---------------------------------------------------------------------------
# Pure-JAX reference (unfolded scales) for correctness check
# ---------------------------------------------------------------------------
def _ref_mbconv(x, p, stride):
    h = jnp.clip(jnp.einsum("nhwc,cd->nhwd", x, p["w_exp"]) * p["s_exp"]
                 + p["b_exp"], 0.0, 6.0)
    C = h.shape[-1]
    w_dw = p["w_dw"].reshape(3, 3, 1, C)                  # HWIO, depthwise
    h = lax.conv_general_dilated(
        h, w_dw, window_strides=(stride, stride), padding=((1, 1), (1, 1)),
        dimension_numbers=("NHWC", "HWIO", "NHWC"), feature_group_count=C)
    h = jnp.clip(h * p["s_dw"] + p["b_dw"], 0.0, 6.0)
    y = jnp.einsum("nhwc,cd->nhwd", h, p["w_proj"]) * p["s_proj"] + p["b_proj"]
    if stride == 1 and x.shape[-1] == y.shape[-1]:
        y = y + x
    return y


def ref_block_forward(x_nchw, params, stride):
    x = jnp.transpose(x_nchw, (0, 2, 3, 1))
    x = _ref_mbconv(x, params["head"], stride)
    for p in params["stack"]:
        x = _ref_mbconv(x, p, 1)
    return jnp.transpose(x, (0, 3, 1, 2))


# ---------------------------------------------------------------------------
if __name__ == "__main__":
    IN_CH, BLOCK_CH, STRIDE, EXPAND, NUM_STACK = 8, 16, 2, 3, 2
    N, H, W = 2, 16, 16

    key = jax.random.PRNGKey(0)
    kx_, kp_ = jax.random.split(key)
    x = jax.random.normal(kx_, (N, IN_CH, H, W), jnp.float32)   # NCHW, like PyTorch
    params = init_block_params(kp_, IN_CH, BLOCK_CH, NUM_STACK, EXPAND)

    fwd = jax.jit(block_forward, static_argnums=(2,))
    out = jax.block_until_ready(fwd(x, params, STRIDE))

    ref = jax.block_until_ready(ref_block_forward(x, params, STRIDE))

    assert out.shape == (N, BLOCK_CH, H // STRIDE, W // STRIDE), out.shape
    err = float(jnp.max(jnp.abs(out - ref)))
    assert jnp.allclose(out, ref, atol=1e-3, rtol=1e-3), err

    print("KERNEL_OK")
</pallas_src>

<mosaic_0001>
module attributes {stable_mosaic.version = 11 : i64} {
  func.func @_block_kernel(%arg0: i32, %arg1: memref<1x256x8xf32, #tpu.memory_space<vmem>>, %arg2: memref<8x128xf32, #tpu.memory_space<vmem>>, %arg3: memref<9x128xf32, #tpu.memory_space<vmem>>, %arg4: memref<128x16xf32, #tpu.memory_space<vmem>>, %arg5: memref<2x16x128xf32, #tpu.memory_space<vmem>>, %arg6: memref<2x9x128xf32, #tpu.memory_space<vmem>>, %arg7: memref<2x128x16xf32, #tpu.memory_space<vmem>>, %arg8: memref<9x128xf32, #tpu.memory_space<vmem>>, %arg9: memref<1x8x8x16xf32, #tpu.memory_space<vmem>>, %arg10: memref<10x24x128xf32, #tpu.memory_space<vmem>>) attributes {dimension_semantics = [#tpu.dimension_semantics<parallel>], iteration_bounds = array<i64: 2>, scalar_prefetch = 0 : i64, scratch_operands = 1 : i64, tpu.core_type = #tpu.core_type<tc>, window_params = [{transform_indices = @transform_0, window_bounds = array<i64: 1, 256, 8>}, {pipeline_mode = #tpu.pipeline_mode<synchronous>, transform_indices = @transform_1, window_bounds = array<i64: 8, 128>}, {pipeline_mode = #tpu.pipeline_mode<synchronous>, transform_indices = @transform_2, window_bounds = array<i64: 9, 128>}, {pipeline_mode = #tpu.pipeline_mode<synchronous>, transform_indices = @transform_3, window_bounds = array<i64: 128, 16>}, {pipeline_mode = #tpu.pipeline_mode<synchronous>, transform_indices = @transform_4, window_bounds = array<i64: 2, 16, 128>}, {pipeline_mode = #tpu.pipeline_mode<synchronous>, transform_indices = @transform_5, window_bounds = array<i64: 2, 9, 128>}, {pipeline_mode = #tpu.pipeline_mode<synchronous>, transform_indices = @transform_6, window_bounds = array<i64: 2, 128, 16>}, {pipeline_mode = #tpu.pipeline_mode<synchronous>, transform_indices = @transform_7, window_bounds = array<i64: 9, 128>}, {transform_indices = @transform_8, window_bounds = array<i64: 1, 8, 8, 16>}]} {
    %cst = arith.constant 0.000000e+00 : f32
    %0 = vector.broadcast %cst : f32 to vector<1x24x128xf32>
    %c0 = arith.constant 0 : index
    %c0_0 = arith.constant 0 : index
    %c0_1 = arith.constant 0 : index
    %1 = vector.load %arg10[%c0, %c0_0, %c0_1] : memref<10x24x128xf32, #tpu.memory_space<vmem>>, vector<1x24x128xf32>
    tpu.vector_store %arg10[%c0, %c0_0, %c0_1], %0 {strides = array<i32>} : memref<10x24x128xf32, #tpu.memory_space<vmem>>, vector<1x24x128xf32>,
    %cst_2 = arith.constant 0.000000e+00 : f32
    %2 = vector.broadcast %cst_2 : f32 to vector<1x24x128xf32>
    %c9 = arith.constant 9 : index
    %c0_3 = arith.constant 0 : index
    %c0_4 = arith.constant 0 : index
    %3 = vector.load %arg10[%c9, %c0_3, %c0_4] : memref<10x24x128xf32, #tpu.memory_space<vmem>>, vector<1x24x128xf32>
    tpu.vector_store %arg10[%c9, %c0_3, %c0_4], %2 {strides = array<i32>} : memref<10x24x128xf32, #tpu.memory_space<vmem>>, vector<1x24x128xf32>,
    %cst_5 = arith.constant 0.000000e+00 : f32
    %4 = vector.broadcast %cst_5 : f32 to vector<8x1x128xf32>
    %c1 = arith.constant 1 : index
    %c7 = arith.constant 7 : index
    %c0_6 = arith.constant 0 : index
    %5 = vector.load %arg10[%c1, %c7, %c0_6] : memref<10x24x128xf32, #tpu.memory_space<vmem>>, vector<8x1x128xf32>
    tpu.vector_store %arg10[%c1, %c7, %c0_6], %4 {strides = array<i32>} : memref<10x24x128xf32, #tpu.memory_space<vmem>>, vector<8x1x128xf32>,
    %cst_7 = arith.constant 0.000000e+00 : f32
    %6 = vector.broadcast %cst_7 : f32 to vector<8x1x128xf32>
    %c1_8 = arith.constant 1 : index
    %c16 = arith.constant 16 : index
    %c0_9 = arith.constant 0 : index
    %7 = vector.load %arg10[%c1_8, %c16, %c0_9] : memref<10x24x128xf32, #tpu.memory_space<vmem>>, vector<8x1x128xf32>
    tpu.vector_store %arg10[%c1_8, %c16, %c0_9], %6 {strides = array<i32>} : memref<10x24x128xf32, #tpu.memory_space<vmem>>, vector<8x1x128xf32>,
    %c0_10 = arith.constant 0 : index
    %c0_11 = arith.constant 0 : index
    %c0_12 = arith.constant 0 : index
    %8 = vector.load %arg1[%c0_10, %c0_11, %c0_12] : memref<1x256x8xf32, #tpu.memory_space<vmem>>, vector<1x256x8xf32>
    %9 = vector.shape_cast %8 : vector<1x256x8xf32> to vector<256x8xf32>
    %c0_13 = arith.constant 0 : index
    %c0_14 = arith.constant 0 : index
    %10 = vector.load %arg2[%c0_13, %c0_14] : memref<8x128xf32, #tpu.memory_space<vmem>>, vector<8x128xf32>
    %cst_15 = arith.constant dense<0.000000e+00> : vector<256x128xf32>
    %11 = tpu.matmul %9, %10, %cst_15 {dimension_numbers = #tpu.dot_dimension_numbers<[1], [0], [0], [1], [0, 0, 1, 1], [], []>} : vector<256x8xf32>, vector<8x128xf32>, vector<256x128xf32> -> vector<256x128xf32>
    %c0_16 = arith.constant 0 : index
    %c0_17 = arith.constant 0 : index
    %12 = vector.load %arg8[%c0_16, %c0_17] : memref<9x128xf32, #tpu.memory_space<vmem>>, vector<1x128xf32>
    %13 = vector.broadcast %12 : vector<1x128xf32> to vector<256x128xf32>
    %14 = arith.addf %11, %13 : vector<256x128xf32>
    %cst_18 = arith.constant 0.000000e+00 : f32
    %cst_19 = arith.constant 6.000000e+00 : f32
    %15 = vector.broadcast %cst_18 : f32 to vector<256x128xf32>
    %16 = arith.maximumf %15, %14 : vector<256x128xf32>
    %17 = vector.broadcast %cst_19 : f32 to vector<256x128xf32>
    %18 = arith.minimumf %17, %16 : vector<256x128xf32>
    %19 = vector.extract_strided_slice %18 {offsets = [0, 0], sizes = [64, 128], strides = [1, 1]} : vector<256x128xf32> to vector<64x128xf32>
    %20 = vector.shape_cast %19 : vector<64x128xf32> to vector<8x8x128xf32>
    %21 = vector.extract_strided_slice %18 {offsets = [64, 0], sizes = [64, 128], strides = [1, 1]} : vector<256x128xf32> to vector<64x128xf32>
    %22 = vector.shape_cast %21 : vector<64x128xf32> to vector<8x8x128xf32>
    %23 = vector.extract_strided_slice %18 {offsets = [128, 0], sizes = [64, 128], strides = [1, 1]} : vector<256x128xf32> to vector<64x128xf32>
    %24 = vector.shape_cast %23 : vector<64x128xf32> to vector<8x8x128xf32>
    %25 = vector.extract_strided_slice %18 {offsets = [192, 0], sizes = [64, 128], strides = [1, 1]} : vector<256x128xf32> to vector<64x128xf32>
    %26 = vector.shape_cast %25 : vector<64x128xf32> to vector<8x8x128xf32>
    %c4 = arith.constant 4 : index
    %c0_20 = arith.constant 0 : index
    %27 = vector.load %arg3[%c4, %c0_20] : memref<9x128xf32, #tpu.memory_space<vmem>>, vector<1x128xf32>
    %28 = vector.shape_cast %27 : vector<1x128xf32> to vector<1x1x128xf32>
    %29 = vector.broadcast %28 : vector<1x1x128xf32> to vector<8x8x128xf32>
    %30 = arith.mulf %20, %29 : vector<8x8x128xf32>
    %c5 = arith.constant 5 : index
    %c0_21 = arith.constant 0 : index
    %31 = vector.load %arg3[%c5, %c0_21] : memref<9x128xf32, #tpu.memory_space<vmem>>, vector<1x128xf32>
    %32 = vector.shape_cast %31 : vector<1x128xf32> to vector<1x1x128xf32>
    %33 = vector.broadcast %32 : vector<1x1x128xf32> to vector<8x8x128xf32>
    %34 = arith.mulf %22, %33 : vector<8x8x128xf32>
    %35 = arith.addf %30, %34 : vector<8x8x128xf32>
    %c7_22 = arith.constant 7 : index
    %c0_23 = arith.constant 0 : index
    %36 = vector.load %arg3[%c7_22, %c0_23] : memref<9x128xf32, #tpu.memory_space<vmem>>, vector<1x128xf32>
    %37 = vector.shape_cast %36 : vector<1x128xf32> to vector<1x1x128xf32>
    %38 = vector.broadcast %37 : vector<1x1x128xf32> to vector<8x8x128xf32>
    %39 = arith.mulf %24, %38 : vector<8x8x128xf32>
    %40 = arith.addf %35, %39 : vector<8x8x128xf32>
    %c8 = arith.constant 8 : index
    %c0_24 = arith.constant 0 : index
    %41 = vector.load %arg3[%c8, %c0_24] : memref<9x128xf32, #tpu.memory_space<vmem>>, vector<1x128xf32>
    %42 = vector.shape_cast %41 : vector<1x128xf32> to vector<1x1x128xf32>
    %43 = vector.broadcast %42 : vector<1x1x128xf32> to vector<8x8x128xf32>
    %44 = arith.mulf %26, %43 : vector<8x8x128xf32>
    %45 = arith.addf %40, %44 : vector<8x8x128xf32>
    %c1_25 = arith.constant 1 : index
    %c8_26 = arith.constant 8 : index
    %c0_27 = arith.constant 0 : index
    %46 = vector.load %arg10[%c1_25, %c8_26, %c0_27] : memref<10x24x128xf32, #tpu.memory_space<vmem>>, vector<8x8x128xf32>
    tpu.vector_store %arg10[%c1_25, %c8_26, %c0_27], %22 {strides = array<i32>} : memref<10x24x128xf32, #tpu.memory_space<vmem>>, vector<8x8x128xf32>,
    %c1_28 = arith.constant 1 : index
    %c7_29 = arith.constant 7 : index
    %c0_30 = arith.constant 0 : index
    %47 = vector.load %arg10[%c1_28, %c7_29, %c0_30] : memref<10x24x128xf32, #tpu.memory_space<vmem>>, vector<8x8x128xf32>
    %c3 = arith.constant 3 : index
    %c0_31 = arith.constant 0 : index
    %48 = vector.load %arg3[%c3, %c0_31] : memref<9x128xf32, #tpu.memory_space<vmem>>, vector<1x128xf32>
    %49 = vector.shape_cast %48 : vector<1x128xf32> to vector<1x1x128xf32>
    %50 = vector.broadcast %49 : vector<1x1x128xf32> to vector<8x8x128xf32>
    %51 = arith.mulf %47, %50 : vector<8x8x128xf32>
    %52 = arith.addf %45, %51 : vector<8x8x128xf32>
    %c1_32 = arith.constant 1 : index
    %c8_33 = arith.constant 8 : index
    %c0_34 = arith.constant 0 : index
    %53 = vector.load %arg10[%c1_32, %c8_33, %c0_34] : memref<10x24x128xf32, #tpu.memory_space<vmem>>, vector<8x8x128xf32>
    tpu.vector_store %arg10[%c1_32, %c8_33, %c0_34], %24 {strides = array<i32>} : memref<10x24x128xf32, #tpu.memory_space<vmem>>, vector<8x8x128xf32>,
    %c0_35 = arith.constant 0 : index
    %c8_36 = arith.constant 8 : index
    %c0_37 = arith.constant 0 : index
    %54 = vector.load %arg10[%c0_35, %c8_36, %c0_37] : memref<10x24x128xf32, #tpu.memory_space<vmem>>, vector<8x8x128xf32>
    %c1_38 = arith.constant 1 : index
    %c0_39 = arith.constant 0 : index
    %55 = vector.load %arg3[%c1_38, %c0_39] : memref<9x128xf32, #tpu.memory_space<vmem>>, vector<1x128xf32>
    %56 = vector.shape_cast %55 : vector<1x128xf32> to vector<1x1x128xf32>
    %57 = vector.broadcast %56 : vector<1x1x128xf32> to vector<8x8x128xf32>
    %58 = arith.mulf %54, %57 : vector<8x8x128xf32>
    %59 = arith.addf %52, %58 : vector<8x8x128xf32>
    %c1_40 = arith.constant 1 : index
    %c8_41 = arith.constant 8 : index
    %c0_42 = arith.constant 0 : index
    %60 = vector.load %arg10[%c1_40, %c8_41, %c0_42] : memref<10x24x128xf32, #tpu.memory_space<vmem>>, vector<8x8x128xf32>
    tpu.vector_store %arg10[%c1_40, %c8_41, %c0_42], %26 {strides = array<i32>} : memref<10x24x128xf32, #tpu.memory_space<vmem>>, vector<8x8x128xf32>,
    %c1_43 = arith.constant 1 : index
    %c7_44 = arith.constant 7 : index
    %c0_45 = arith.constant 0 : index
    %61 = vector.load %arg10[%c1_43, %c7_44, %c0_45] : memref<10x24x128xf32, #tpu.memory_space<vmem>>, vector<8x8x128xf32>
    %c6 = arith.constant 6 : index
    %c0_46 = arith.constant 0 : index
    %62 = vector.load %arg3[%c6, %c0_46] : memref<9x128xf32, #tpu.memory_space<vmem>>, vector<1x128xf32>
    %63 = vector.shape_cast %62 : vector<1x128xf32> to vector<1x1x128xf32>
    %64 = vector.broadcast %63 : vector<1x1x128xf32> to vector<8x8x128xf32>
    %65 = arith.mulf %61, %64 : vector<8x8x128xf32>
    %66 = arith.addf %59, %65 : vector<8x8x128xf32>
    %c0_47 = arith.constant 0 : index
    %c8_48 = arith.constant 8 : index
    %c0_49 = arith.constant 0 : index
    %67 = vector.load %arg10[%c0_47, %c8_48, %c0_49] : memref<10x24x128xf32, #tpu.memory_space<vmem>>, vector<8x8x128xf32>
    %c2 = arith.constant 2 : index
    %c0_50 = arith.constant 0 : index
    %68 = vector.load %arg3[%c2, %c0_50] : memref<9x128xf32, #tpu.memory_space<vmem>>, vector<1x128xf32>
    %69 = vector.shape_cast %68 : vector<1x128xf32> to vector<1x1x128xf32>
    %70 = vector.broadcast %69 : vector<1x1x128xf32> to vector<8x8x128xf32>
    %71 = arith.mulf %67, %70 : vector<8x8x128xf32>
    %72 = arith.addf %66, %71 : vector<8x8x128xf32>
    %c0_51 = arith.constant 0 : index
    %c7_52 = arith.constant 7 : index
    %c0_53 = arith.constant 0 : index
    %73 = vector.load %arg10[%c0_51, %c7_52, %c0_53] : memref<10x24x128xf32, #tpu.memory_space<vmem>>, vector<8x8x128xf32>
    %c0_54 = arith.constant 0 : index
    %c0_55 = arith.constant 0 : index
    %74 = vector.load %arg3[%c0_54, %c0_55] : memref<9x128xf32, #tpu.memory_space<vmem>>, vector<1x128xf32>
    %75 = vector.shape_cast %74 : vector<1x128xf32> to vector<1x1x128xf32>
    %76 = vector.broadcast %75 : vector<1x1x128xf32> to vector<8x8x128xf32>
    %77 = arith.mulf %73, %76 : vector<8x8x128xf32>
    %78 = arith.addf %72, %77 : vector<8x8x128xf32>
    %79 = vector.shape_cast %78 : vector<8x8x128xf32> to vector<64x128xf32>
    %c1_56 = arith.constant 1 : index
    %c0_57 = arith.constant 0 : index
    %80 = vector.load %arg8[%c1_56, %c0_57] : memref<9x128xf32, #tpu.memory_space<vmem>>, vector<1x128xf32>
    %81 = vector.broadcast %80 : vector<1x128xf32> to vector<64x128xf32>
    %82 = arith.addf %79, %81 : vector<64x128xf32>
    %cst_58 = arith.constant 0.000000e+00 : f32
    %cst_59 = arith.constant 6.000000e+00 : f32
    %83 = vector.broadcast %cst_58 : f32 to vector<64x128xf32>
    %84 = arith.maximumf %83, %82 : vector<64x128xf32>
    %85 = vector.broadcast %cst_59 : f32 to vector<64x128xf32>
    %86 = arith.minimumf %85, %84 : vector<64x128xf32>
    %c0_60 = arith.constant 0 : index
    %c0_61 = arith.constant 0 : index
    %87 = vector.load %arg4[%c0_60, %c0_61] : memref<128x16xf32, #tpu.memory_space<vmem>>, vector<128x16xf32>
    %cst_62 = arith.constant dense<0.000000e+00> : vector<64x16xf32>
    %88 = tpu.matmul %86, %87, %cst_62 {dimension_numbers = #tpu.dot_dimension_numbers<[1], [0], [0], [1], [0, 0, 1, 1], [], []>} : vector<64x128xf32>, vector<128x16xf32>, vector<64x16xf32> -> vector<64x16xf32>
    %c2_63 = arith.constant 2 : index
    %c0_64 = arith.constant 0 : index
    %89 = vector.load %arg8[%c2_63, %c0_64] : memref<9x128xf32, #tpu.memory_space<vmem>>, vector<1x16xf32>
    %90 = vector.broadcast %89 : vector<1x16xf32> to vector<64x16xf32>
    %91 = arith.addf %88, %90 : vector<64x16xf32>
    %c0_65 = arith.constant 0 : index
    %c0_66 = arith.constant 0 : index
    %c0_67 = arith.constant 0 : index
    %92 = vector.load %arg5[%c0_65, %c0_66, %c0_67] : memref<2x16x128xf32, #tpu.memory_space<vmem>>, vector<1x16x128xf32>
    %93 = vector.shape_cast %92 : vector<1x16x128xf32> to vector<16x128xf32>
    %cst_68 = arith.constant dense<0.000000e+00> : vector<64x128xf32>
    %94 = tpu.matmul %91, %93, %cst_68 {dimension_numbers = #tpu.dot_dimension_numbers<[1], [0], [0], [1], [0, 0, 1, 1], [], []>} : vector<64x16xf32>, vector<16x128xf32>, vector<64x128xf32> -> vector<64x128xf32>
    %c3_69 = arith.constant 3 : index
    %c0_70 = arith.constant 0 : index
    %95 = vector.load %arg8[%c3_69, %c0_70] : memref<9x128xf32, #tpu.memory_space<vmem>>, vector<1x128xf32>
    %96 = vector.broadcast %95 : vector<1x128xf32> to vector<64x128xf32>
    %97 = arith.addf %94, %96 : vector<64x128xf32>
    %cst_71 = arith.constant 0.000000e+00 : f32
    %cst_72 = arith.constant 6.000000e+00 : f32
    %98 = vector.broadcast %cst_71 : f32 to vector<64x128xf32>
    %99 = arith.maximumf %98, %97 : vector<64x128xf32>
    %100 = vector.broadcast %cst_72 : f32 to vector<64x128xf32>
    %101 = arith.minimumf %100, %99 : vector<64x128xf32>
    %102 = vector.shape_cast %101 : vector<64x128xf32> to vector<8x8x128xf32>
    %c1_73 = arith.constant 1 : index
    %c8_74 = arith.constant 8 : index
    %c0_75 = arith.constant 0 : index
    %103 = vector.load %arg10[%c1_73, %c8_74, %c0_75] : memref<10x24x128xf32, #tpu.memory_space<vmem>>, vector<8x8x128xf32>
    tpu.vector_store %arg10[%c1_73, %c8_74, %c0_75], %102 {strides = array<i32>} : memref<10x24x128xf32, #tpu.memory_space<vmem>>, vector<8x8x128xf32>,
    %cst_76 = arith.constant 0.000000e+00 : f32
    %104 = vector.broadcast %cst_76 : f32 to vector<8x8x128xf32>
    %c0_77 = arith.constant 0 : index
    %c7_78 = arith.constant 7 : index
    %c0_79 = arith.constant 0 : index
    %105 = vector.load %arg10[%c0_77, %c7_78, %c0_79] : memref<10x24x128xf32, #tpu.memory_space<vmem>>, vector<10x8x128xf32>
    %c0_80 = arith.constant 0 : index
    %c0_81 = arith.constant 0 : index
    %c0_82 = arith.constant 0 : index
    %106 = vector.load %arg6[%c0_80, %c0_81, %c0_82] : memref<2x9x128xf32, #tpu.memory_space<vmem>>, vector<1x1x128xf32>
    %107 = vector.shape_cast %106 : vector<1x1x128xf32> to vector<1x128xf32>
    %108 = vector.shape_cast %107 : vector<1x128xf32> to vector<1x1x128xf32>
    %109 = vector.extract_strided_slice %105 {offsets = [0, 0, 0], sizes = [8, 8, 128], strides = [1, 1, 1]} : vector<10x8x128xf32> to vector<8x8x128xf32>
    %110 = vector.broadcast %108 : vector<1x1x128xf32> to vector<8x8x128xf32>
    %111 = arith.mulf %109, %110 : vector<8x8x128xf32>
    %112 = arith.addf %104, %111 : vector<8x8x128xf32>
    %c0_83 = arith.constant 0 : index
    %c3_84 = arith.constant 3 : index
    %c0_85 = arith.constant 0 : index
    %113 = vector.load %arg6[%c0_83, %c3_84, %c0_85] : memref<2x9x128xf32, #tpu.memory_space<vmem>>, vector<1x1x128xf32>
    %114 = vector.shape_cast %113 : vector<1x1x128xf32> to vector<1x128xf32>
    %115 = vector.shape_cast %114 : vector<1x128xf32> to vector<1x1x128xf32>
    %116 = vector.extract_strided_slice %105 {offsets = [1, 0, 0], sizes = [8, 8, 128], strides = [1, 1, 1]} : vector<10x8x128xf32> to vector<8x8x128xf32>
    %117 = vector.broadcast %115 : vector<1x1x128xf32> to vector<8x8x128xf32>
    %118 = arith.mulf %116, %117 : vector<8x8x128xf32>
    %119 = arith.addf %112, %118 : vector<8x8x128xf32>
    %c0_86 = arith.constant 0 : index
    %c6_87 = arith.constant 6 : index
    %c0_88 = arith.constant 0 : index
    %120 = vector.load %arg6[%c0_86, %c6_87, %c0_88] : memref<2x9x128xf32, #tpu.memory_space<vmem>>, vector<1x1x128xf32>
    %121 = vector.shape_cast %120 : vector<1x1x128xf32> to vector<1x128xf32>
    %122 = vector.shape_cast %121 : vector<1x128xf32> to vector<1x1x128xf32>
    %123 = vector.extract_strided_slice %105 {offsets = [2, 0, 0], sizes = [8, 8, 128], strides = [1, 1, 1]} : vector<10x8x128xf32> to vector<8x8x128xf32>
    %124 = vector.broadcast %122 : vector<1x1x128xf32> to vector<8x8x128xf32>
    %125 = arith.mulf %123, %124 : vector<8x8x128xf32>
    %126 = arith.addf %119, %125 : vector<8x8x128xf32>
    %c0_89 = arith.constant 0 : index
    %c8_90 = arith.constant 8 : index
    %c0_91 = arith.constant 0 : index
    %127 = vector.load %arg10[%c0_89, %c8_90, %c0_91] : memref<10x24x128xf32, #tpu.memory_space<vmem>>, vector<10x8x128xf32>
    %c0_92 = arith.constant 0 : index
    %c1_93 = arith.constant 1 : index
    %c0_94 = arith.constant 0 : index
    %128 = vector.load %arg6[%c0_92, %c1_93, %c0_94] : memref<2x9x128xf32, #tpu.memory_space<vmem>>, vector<1x1x128xf32>
    %129 = vector.shape_cast %128 : vector<1x1x128xf32> to vector<1x128xf32>
    %130 = vector.shape_cast %129 : vector<1x128xf32> to vector<1x1x128xf32>
    %131 = vector.extract_strided_slice %127 {offsets = [0, 0, 0], sizes = [8, 8, 128], strides = [1, 1, 1]} : vector<10x8x128xf32> to vector<8x8x128xf32>
    %132 = vector.broadcast %130 : vector<1x1x128xf32> to vector<8x8x128xf32>
    %133 = arith.mulf %131, %132 : vector<8x8x128xf32>
    %134 = arith.addf %126, %133 : vector<8x8x128xf32>
    %c0_95 = arith.constant 0 : index
    %c4_96 = arith.constant 4 : index
    %c0_97 = arith.constant 0 : index
    %135 = vector.load %arg6[%c0_95, %c4_96, %c0_97] : memref<2x9x128xf32, #tpu.memory_space<vmem>>, vector<1x1x128xf32>
    %136 = vector.shape_cast %135 : vector<1x1x128xf32> to vector<1x128xf32>
    %137 = vector.shape_cast %136 : vector<1x128xf32> to vector<1x1x128xf32>
    %138 = vector.extract_strided_slice %127 {offsets = [1, 0, 0], sizes = [8, 8, 128], strides = [1, 1, 1]} : vector<10x8x128xf32> to vector<8x8x128xf32>
    %139 = vector.broadcast %137 : vector<1x1x128xf32> to vector<8x8x128xf32>
    %140 = arith.mulf %138, %139 : vector<8x8x128xf32>
    %141 = arith.addf %134, %140 : vector<8x8x128xf32>
    %c0_98 = arith.constant 0 : index
    %c7_99 = arith.constant 7 : index
    %c0_100 = arith.constant 0 : index
    %142 = vector.load %arg6[%c0_98, %c7_99, %c0_100] : memref<2x9x128xf32, #tpu.memory_space<vmem>>, vector<1x1x128xf32>
    %143 = vector.shape_cast %142 : vector<1x1x128xf32> to vector<1x128xf32>
    %144 = vector.shape_cast %143 : vector<1x128xf32> to vector<1x1x128xf32>
    %145 = vector.extract_strided_slice %127 {offsets = [2, 0, 0], sizes = [8, 8, 128], strides = [1, 1, 1]} : vector<10x8x128xf32> to vector<8x8x128xf32>
    %146 = vector.broadcast %144 : vector<1x1x128xf32> to vector<8x8x128xf32>
    %147 = arith.mulf %145, %146 : vector<8x8x128xf32>
    %148 = arith.addf %141, %147 : vector<8x8x128xf32>
    %c0_101 = arith.constant 0 : index
    %c9_102 = arith.constant 9 : index
    %c0_103 = arith.constant 0 : index
    %149 = vector.load %arg10[%c0_101, %c9_102, %c0_103] : memref<10x24x128xf32, #tpu.memory_space<vmem>>, vector<10x8x128xf32>
    %c0_104 = arith.constant 0 : index
    %c2_105 = arith.constant 2 : index
    %c0_106 = arith.constant 0 : index
    %150 = vector.load %arg6[%c0_104, %c2_105, %c0_106] : memref<2x9x128xf32, #tpu.memory_space<vmem>>, vector<1x1x128xf32>
    %151 = vector.shape_cast %150 : vector<1x1x128xf32> to vector<1x128xf32>
    %152 = vector.shape_cast %151 : vector<1x128xf32> to vector<1x1x128xf32>
    %153 = vector.extract_strided_slice %149 {offsets = [0, 0, 0], sizes = [8, 8, 128], strides = [1, 1, 1]} : vector<10x8x128xf32> to vector<8x8x128xf32>
    %154 = vector.broadcast %152 : vector<1x1x128xf32> to vector<8x8x128xf32>
    %155 = arith.mulf %153, %154 : vector<8x8x128xf32>
    %156 = arith.addf %148, %155 : vector<8x8x128xf32>
    %c0_107 = arith.constant 0 : index
    %c5_108 = arith.constant 5 : index
    %c0_109 = arith.constant 0 : index
    %157 = vector.load %arg6[%c0_107, %c5_108, %c0_109] : memref<2x9x128xf32, #tpu.memory_space<vmem>>, vector<1x1x128xf32>
    %158 = vector.shape_cast %157 : vector<1x1x128xf32> to vector<1x128xf32>
    %159 = vector.shape_cast %158 : vector<1x128xf32> to vector<1x1x128xf32>
    %160 = vector.extract_strided_slice %149 {offsets = [1, 0, 0], sizes = [8, 8, 128], strides = [1, 1, 1]} : vector<10x8x128xf32> to vector<8x8x128xf32>
    %161 = vector.broadcast %159 : vector<1x1x128xf32> to vector<8x8x128xf32>
    %162 = arith.mulf %160, %161 : vector<8x8x128xf32>
    %163 = arith.addf %156, %162 : vector<8x8x128xf32>
    %c0_110 = arith.constant 0 : index
    %c8_111 = arith.constant 8 : index
    %c0_112 = arith.constant 0 : index
    %164 = vector.load %arg6[%c0_110, %c8_111, %c0_112] : memref<2x9x128xf32, #tpu.memory_space<vmem>>, vector<1x1x128xf32>
    %165 = vector.shape_cast %164 : vector<1x1x128xf32> to vector<1x128xf32>
    %166 = vector.shape_cast %165 : vector<1x128xf32> to vector<1x1x128xf32>
    %167 = vector.extract_strided_slice %149 {offsets = [2, 0, 0], sizes = [8, 8, 128], strides = [1, 1, 1]} : vector<10x8x128xf32> to vector<8x8x128xf32>
    %168 = vector.broadcast %166 : vector<1x1x128xf32> to vector<8x8x128xf32>
    %169 = arith.mulf %167, %168 : vector<8x8x128xf32>
    %170 = arith.addf %163, %169 : vector<8x8x128xf32>
    %171 = vector.shape_cast %170 : vector<8x8x128xf32> to vector<64x128xf32>
    %c4_113 = arith.constant 4 : index
    %c0_114 = arith.constant 0 : index
    %172 = vector.load %arg8[%c4_113, %c0_114] : memref<9x128xf32, #tpu.memory_space<vmem>>, vector<1x128xf32>
    %173 = vector.broadcast %172 : vector<1x128xf32> to vector<64x128xf32>
    %174 = arith.addf %171, %173 : vector<64x128xf32>
    %cst_115 = arith.constant 0.000000e+00 : f32
    %cst_116 = arith.constant 6.000000e+00 : f32
    %175 = vector.broadcast %cst_115 : f32 to vector<64x128xf32>
    %176 = arith.maximumf %175, %174 : vector<64x128xf32>
    %177 = vector.broadcast %cst_116 : f32 to vector<64x128xf32>
    %178 = arith.minimumf %177, %176 : vector<64x128xf32>
    %c0_117 = arith.constant 0 : index
    %c0_118 = arith.constant 0 : index
    %c0_119 = arith.constant 0 : index
    %179 = vector.load %arg7[%c0_117, %c0_118, %c0_119] : memref<2x128x16xf32, #tpu.memory_space<vmem>>, vector<1x128x16xf32>
    %180 = vector.shape_cast %179 : vector<1x128x16xf32> to vector<128x16xf32>
    %cst_120 = arith.constant dense<0.000000e+00> : vector<64x16xf32>
    %181 = tpu.matmul %178, %180, %cst_120 {dimension_numbers = #tpu.dot_dimension_numbers<[1], [0], [0], [1], [0, 0, 1, 1], [], []>} : vector<64x128xf32>, vector<128x16xf32>, vector<64x16xf32> -> vector<64x16xf32>
    %182 = arith.addf %91, %181 : vector<64x16xf32>
    %c5_121 = arith.constant 5 : index
    %c0_122 = arith.constant 0 : index
    %183 = vector.load %arg8[%c5_121, %c0_122] : memref<9x128xf32, #tpu.memory_space<vmem>>, vector<1x16xf32>
    %184 = vector.broadcast %183 : vector<1x16xf32> to vector<64x16xf32>
    %185 = arith.addf %182, %184 : vector<64x16xf32>
    %c1_123 = arith.constant 1 : index
    %c0_124 = arith.constant 0 : index
    %c0_125 = arith.constant 0 : index
    %186 = vector.load %arg5[%c1_123, %c0_124, %c0_125] : memref<2x16x128xf32, #tpu.memory_space<vmem>>, vector<1x16x128xf32>
    %187 = vector.shape_cast %186 : vector<1x16x128xf32> to vector<16x128xf32>
    %cst_126 = arith.constant dense<0.000000e+00> : vector<64x128xf32>
    %188 = tpu.matmul %185, %187, %cst_126 {dimension_numbers = #tpu.dot_dimension_numbers<[1], [0], [0], [1], [0, 0, 1, 1], [], []>} : vector<64x16xf32>, vector<16x128xf32>, vector<64x128xf32> -> vector<64x128xf32>
    %c6_127 = arith.constant 6 : index
    %c0_128 = arith.constant 0 : index
    %189 = vector.load %arg8[%c6_127, %c0_128] : memref<9x128xf32, #tpu.memory_space<vmem>>, vector<1x128xf32>
    %190 = vector.broadcast %189 : vector<1x128xf32> to vector<64x128xf32>
    %191 = arith.addf %188, %190 : vector<64x128xf32>
    %cst_129 = arith.constant 0.000000e+00 : f32
    %cst_130 = arith.constant 6.000000e+00 : f32
    %192 = vector.broadcast %cst_129 : f32 to vector<64x128xf32>
    %193 = arith.maximumf %192, %191 : vector<64x128xf32>
    %194 = vector.broadcast %cst_130 : f32 to vector<64x128xf32>
    %195 = arith.minimumf %194, %193 : vector<64x128xf32>
    %196 = vector.shape_cast %195 : vector<64x128xf32> to vector<8x8x128xf32>
    %c1_131 = arith.constant 1 : index
    %c8_132 = arith.constant 8 : index
    %c0_133 = arith.constant 0 : index
    %197 = vector.load %arg10[%c1_131, %c8_132, %c0_133] : memref<10x24x128xf32, #tpu.memory_space<vmem>>, vector<8x8x128xf32>
    tpu.vector_store %arg10[%c1_131, %c8_132, %c0_133], %196 {strides = array<i32>} : memref<10x24x128xf32, #tpu.memory_space<vmem>>, vector<8x8x128xf32>,
    %cst_134 = arith.constant 0.000000e+00 : f32
    %198 = vector.broadcast %cst_134 : f32 to vector<8x8x128xf32>
    %c0_135 = arith.constant 0 : index
    %c7_136 = arith.constant 7 : index
    %c0_137 = arith.constant 0 : index
    %199 = vector.load %arg10[%c0_135, %c7_136, %c0_137] : memref<10x24x128xf32, #tpu.memory_space<vmem>>, vector<10x8x128xf32>
    %c1_138 = arith.constant 1 : index
    %c0_139 = arith.constant 0 : index
    %c0_140 = arith.constant 0 : index
    %200 = vector.load %arg6[%c1_138, %c0_139, %c0_140] : memref<2x9x128xf32, #tpu.memory_space<vmem>>, vector<1x1x128xf32>
    %201 = vector.shape_cast %200 : vector<1x1x128xf32> to vector<1x128xf32>
    %202 = vector.shape_cast %201 : vector<1x128xf32> to vector<1x1x128xf32>
    %203 = vector.extract_strided_slice %199 {offsets = [0, 0, 0], sizes = [8, 8, 128], strides = [1, 1, 1]} : vector<10x8x128xf32> to vector<8x8x128xf32>
    %204 = vector.broadcast %202 : vector<1x1x128xf32> to vector<8x8x128xf32>
    %205 = arith.mulf %203, %204 : vector<8x8x128xf32>
    %206 = arith.addf %198, %205 : vector<8x8x128xf32>
    %c1_141 = arith.constant 1 : index
    %c3_142 = arith.constant 3 : index
    %c0_143 = arith.constant 0 : index
    %207 = vector.load %arg6[%c1_141, %c3_142, %c0_143] : memref<2x9x128xf32, #tpu.memory_space<vmem>>, vector<1x1x128xf32>
    %208 = vector.shape_cast %207 : vector<1x1x128xf32> to vector<1x128xf32>
    %209 = vector.shape_cast %208 : vector<1x128xf32> to vector<1x1x128xf32>
    %210 = vector.extract_strided_slice %199 {offsets = [1, 0, 0], sizes = [8, 8, 128], strides = [1, 1, 1]} : vector<10x8x128xf32> to vector<8x8x128xf32>
    %211 = vector.broadcast %209 : vector<1x1x128xf32> to vector<8x8x128xf32>
    %212 = arith.mulf %210, %211 : vector<8x8x128xf32>
    %213 = arith.addf %206, %212 : vector<8x8x128xf32>
    %c1_144 = arith.constant 1 : index
    %c6_145 = arith.constant 6 : index
    %c0_146 = arith.constant 0 : index
    %214 = vector.load %arg6[%c1_144, %c6_145, %c0_146] : memref<2x9x128xf32, #tpu.memory_space<vmem>>, vector<1x1x128xf32>
    %215 = vector.shape_cast %214 : vector<1x1x128xf32> to vector<1x128xf32>
    %216 = vector.shape_cast %215 : vector<1x128xf32> to vector<1x1x128xf32>
    %217 = vector.extract_strided_slice %199 {offsets = [2, 0, 0], sizes = [8, 8, 128], strides = [1, 1, 1]} : vector<10x8x128xf32> to vector<8x8x128xf32>
    %218 = vector.broadcast %216 : vector<1x1x128xf32> to vector<8x8x128xf32>
    %219 = arith.mulf %217, %218 : vector<8x8x128xf32>
    %220 = arith.addf %213, %219 : vector<8x8x128xf32>
    %c0_147 = arith.constant 0 : index
    %c8_148 = arith.constant 8 : index
    %c0_149 = arith.constant 0 : index
    %221 = vector.load %arg10[%c0_147, %c8_148, %c0_149] : memref<10x24x128xf32, #tpu.memory_space<vmem>>, vector<10x8x128xf32>
    %c1_150 = arith.constant 1 : index
    %c1_151 = arith.constant 1 : index
    %c0_152 = arith.constant 0 : index
    %222 = vector.load %arg6[%c1_150, %c1_151, %c0_152] : memref<2x9x128xf32, #tpu.memory_space<vmem>>, vector<1x1x128xf32>
    %223 = vector.shape_cast %222 : vector<1x1x128xf32> to vector<1x128xf32>
    %224 = vector.shape_cast %223 : vector<1x128xf32> to vector<1x1x128xf32>
    %225 = vector.extract_strided_slice %221 {offsets = [0, 0, 0], sizes = [8, 8, 128], strides = [1, 1, 1]} : vector<10x8x128xf32> to vector<8x8x128xf32>
    %226 = vector.broadcast %224 : vector<1x1x128xf32> to vector<8x8x128xf32>
    %227 = arith.mulf %225, %226 : vector<8x8x128xf32>
    %228 = arith.addf %220, %227 : vector<8x8x128xf32>
    %c1_153 = arith.constant 1 : index
    %c4_154 = arith.constant 4 : index
    %c0_155 = arith.constant 0 : index
    %229 = vector.load %arg6[%c1_153, %c4_154, %c0_155] : memref<2x9x128xf32, #tpu.memory_space<vmem>>, vector<1x1x128xf32>
    %230 = vector.shape_cast %229 : vector<1x1x128xf32> to vector<1x128xf32>
    %231 = vector.shape_cast %230 : vector<1x128xf32> to vector<1x1x128xf32>
    %232 = vector.extract_strided_slice %221 {offsets = [1, 0, 0], sizes = [8, 8, 128], strides = [1, 1, 1]} : vector<10x8x128xf32> to vector<8x8x128xf32>
    %233 = vector.broadcast %231 : vector<1x1x128xf32> to vector<8x8x128xf32>
    %234 = arith.mulf %232, %233 : vector<8x8x128xf32>
    %235 = arith.addf %228, %234 : vector<8x8x128xf32>
    %c1_156 = arith.constant 1 : index
    %c7_157 = arith.constant 7 : index
    %c0_158 = arith.constant 0 : index
    %236 = vector.load %arg6[%c1_156, %c7_157, %c0_158] : memref<2x9x128xf32, #tpu.memory_space<vmem>>, vector<1x1x128xf32>
    %237 = vector.shape_cast %236 : vector<1x1x128xf32> to vector<1x128xf32>
    %238 = vector.shape_cast %237 : vector<1x128xf32> to vector<1x1x128xf32>
    %239 = vector.extract_strided_slice %221 {offsets = [2, 0, 0], sizes = [8, 8, 128], strides = [1, 1, 1]} : vector<10x8x128xf32> to vector<8x8x128xf32>
    %240 = vector.broadcast %238 : vector<1x1x128xf32> to vector<8x8x128xf32>
    %241 = arith.mulf %239, %240 : vector<8x8x128xf32>
    %242 = arith.addf %235, %241 : vector<8x8x128xf32>
    %c0_159 = arith.constant 0 : index
    %c9_160 = arith.constant 9 : index
    %c0_161 = arith.constant 0 : index
    %243 = vector.load %arg10[%c0_159, %c9_160, %c0_161] : memref<10x24x128xf32, #tpu.memory_space<vmem>>, vector<10x8x128xf32>
    %c1_162 = arith.constant 1 : index
    %c2_163 = arith.constant 2 : index
    %c0_164 = arith.constant 0 : index
    %244 = vector.load %arg6[%c1_162, %c2_163, %c0_164] : memref<2x9x128xf32, #tpu.memory_space<vmem>>, vector<1x1x128xf32>
    %245 = vector.shape_cast %244 : vector<1x1x128xf32> to vector<1x128xf32>
    %246 = vector.shape_cast %245 : vector<1x128xf32> to vector<1x1x128xf32>
    %247 = vector.extract_strided_slice %243 {offsets = [0, 0, 0], sizes = [8, 8, 128], strides = [1, 1, 1]} : vector<10x8x128xf32> to vector<8x8x128xf32>
    %248 = vector.broadcast %246 : vector<1x1x128xf32> to vector<8x8x128xf32>
    %249 = arith.mulf %247, %248 : vector<8x8x128xf32>
    %250 = arith.addf %242, %249 : vector<8x8x128xf32>
    %c1_165 = arith.constant 1 : index
    %c5_166 = arith.constant 5 : index
    %c0_167 = arith.constant 0 : index
    %251 = vector.load %arg6[%c1_165, %c5_166, %c0_167] : memref<2x9x128xf32, #tpu.memory_space<vmem>>, vector<1x1x128xf32>
    %252 = vector.shape_cast %251 : vector<1x1x128xf32> to vector<1x128xf32>
    %253 = vector.shape_cast %252 : vector<1x128xf32> to vector<1x1x128xf32>
    %254 = vector.extract_strided_slice %243 {offsets = [1, 0, 0], sizes = [8, 8, 128], strides = [1, 1, 1]} : vector<10x8x128xf32> to vector<8x8x128xf32>
    %255 = vector.broadcast %253 : vector<1x1x128xf32> to vector<8x8x128xf32>
    %256 = arith.mulf %254, %255 : vector<8x8x128xf32>
    %257 = arith.addf %250, %256 : vector<8x8x128xf32>
    %c1_168 = arith.constant 1 : index
    %c8_169 = arith.constant 8 : index
    %c0_170 = arith.constant 0 : index
    %258 = vector.load %arg6[%c1_168, %c8_169, %c0_170] : memref<2x9x128xf32, #tpu.memory_space<vmem>>, vector<1x1x128xf32>
    %259 = vector.shape_cast %258 : vector<1x1x128xf32> to vector<1x128xf32>
    %260 = vector.shape_cast %259 : vector<1x128xf32> to vector<1x1x128xf32>
    %261 = vector.extract_strided_slice %243 {offsets = [2, 0, 0], sizes = [8, 8, 128], strides = [1, 1, 1]} : vector<10x8x128xf32> to vector<8x8x128xf32>
    %262 = vector.broadcast %260 : vector<1x1x128xf32> to vector<8x8x128xf32>
    %263 = arith.mulf %261, %262 : vector<8x8x128xf32>
    %264 = arith.addf %257, %263 : vector<8x8x128xf32>
    %265 = vector.shape_cast %264 : vector<8x8x128xf32> to vector<64x128xf32>
    %c7_171 = arith.constant 7 : index
    %c0_172 = arith.constant 0 : index
    %266 = vector.load %arg8[%c7_171, %c0_172] : memref<9x128xf32, #tpu.memory_space<vmem>>, vector<1x128xf32>
    %267 = vector.broadcast %266 : vector<1x128xf32> to vector<64x128xf32>
    %268 = arith.addf %265, %267 : vector<64x128xf32>
    %cst_173 = arith.constant 0.000000e+00 : f32
    %cst_174 = arith.constant 6.000000e+00 : f32
    %269 = vector.broadcast %cst_173 : f32 to vector<64x128xf32>
    %270 = arith.maximumf %269, %268 : vector<64x128xf32>
    %271 = vector.broadcast %cst_174 : f32 to vector<64x128xf32>
    %272 = arith.minimumf %271, %270 : vector<64x128xf32>
    %c1_175 = arith.constant 1 : index
    %c0_176 = arith.constant 0 : index
    %c0_177 = arith.constant 0 : index
    %273 = vector.load %arg7[%c1_175, %c0_176, %c0_177] : memref<2x128x16xf32, #tpu.memory_space<vmem>>, vector<1x128x16xf32>
    %274 = vector.shape_cast %273 : vector<1x128x16xf32> to vector<128x16xf32>
    %cst_178 = arith.constant dense<0.000000e+00> : vector<64x16xf32>
    %275 = tpu.matmul %272, %274, %cst_178 {dimension_numbers = #tpu.dot_dimension_numbers<[1], [0], [0], [1], [0, 0, 1, 1], [], []>} : vector<64x128xf32>, vector<128x16xf32>, vector<64x16xf32> -> vector<64x16xf32>
    %276 = arith.addf %185, %275 : vector<64x16xf32>
    %c8_179 = arith.constant 8 : index
    %c0_180 = arith.constant 0 : index
    %277 = vector.load %arg8[%c8_179, %c0_180] : memref<9x128xf32, #tpu.memory_space<vmem>>, vector<1x16xf32>
    %278 = vector.broadcast %277 : vector<1x16xf32> to vector<64x16xf32>
    %279 = arith.addf %276, %278 : vector<64x16xf32>
    %280 = vector.shape_cast %279 : vector<64x16xf32> to vector<8x8x16xf32>
    %c0_181 = arith.constant 0 : index
    %c0_182 = arith.constant 0 : index
    %c0_183 = arith.constant 0 : index
    %c0_184 = arith.constant 0 : index
    %281 = vector.load %arg9[%c0_181, %c0_182, %c0_183, %c0_184] : memref<1x8x8x16xf32, #tpu.memory_space<vmem>>, vector<1x8x8x16xf32>
    %282 = vector.shape_cast %281 : vector<1x8x8x16xf32> to vector<8x8x16xf32>
    %283 = vector.shape_cast %280 : vector<8x8x16xf32> to vector<1x8x8x16xf32>
    tpu.vector_store %arg9[%c0_181, %c0_182, %c0_183, %c0_184], %283 {strides = array<i32>} : memref<1x8x8x16xf32, #tpu.memory_space<vmem>>, vector<1x8x8x16xf32>,
    return
  }
  func.func @transform_0(%arg0: i32) -> (i32, i32, i32) {
    %c0_i32 = arith.constant 0 : i32
    %c0_i32_0 = arith.constant 0 : i32
    %c0_i32_1 = arith.constant 0 : i32
    return %arg0, %c0_i32, %c0_i32_0 : i32, i32, i32
  }
  func.func @transform_1(%arg0: i32) -> (i32, i32) {
    %c0_i32 = arith.constant 0 : i32
    %c0_i32_0 = arith.constant 0 : i32
    %c0_i32_1 = arith.constant 0 : i32
    return %c0_i32, %c0_i32_0 : i32, i32
  }
  func.func @transform_2(%arg0: i32) -> (i32, i32) {
    %c0_i32 = arith.constant 0 : i32
    %c0_i32_0 = arith.constant 0 : i32
    %c0_i32_1 = arith.constant 0 : i32
    return %c0_i32, %c0_i32_0 : i32, i32
  }
  func.func @transform_3(%arg0: i32) -> (i32, i32) {
    %c0_i32 = arith.constant 0 : i32
    %c0_i32_0 = arith.constant 0 : i32
    %c0_i32_1 = arith.constant 0 : i32
    return %c0_i32, %c0_i32_0 : i32, i32
  }
  func.func @transform_4(%arg0: i32) -> (i32, i32, i32) {
    %c0_i32 = arith.constant 0 : i32
    %c0_i32_0 = arith.constant 0 : i32
    %c0_i32_1 = arith.constant 0 : i32
    %c0_i32_2 = arith.constant 0 : i32
    return %c0_i32, %c0_i32_0, %c0_i32_1 : i32, i32, i32
  }
  func.func @transform_5(%arg0: i32) -> (i32, i32, i32) {
    %c0_i32 = arith.constant 0 : i32
    %c0_i32_0 = arith.constant 0 : i32
    %c0_i32_1 = arith.constant 0 : i32
    %c0_i32_2 = arith.constant 0 : i32
    return %c0_i32, %c0_i32_0, %c0_i32_1 : i32, i32, i32
  }
  func.func @transform_6(%arg0: i32) -> (i32, i32, i32) {
    %c0_i32 = arith.constant 0 : i32
    %c0_i32_0 = arith.constant 0 : i32
    %c0_i32_1 = arith.constant 0 : i32
    %c0_i32_2 = arith.constant 0 : i32
    return %c0_i32, %c0_i32_0, %c0_i32_1 : i32, i32, i32
  }
  func.func @transform_7(%arg0: i32) -> (i32, i32) {
    %c0_i32 = arith.constant 0 : i32
    %c0_i32_0 = arith.constant 0 : i32
    %c0_i32_1 = arith.constant 0 : i32
    return %c0_i32, %c0_i32_0 : i32, i32
  }
  func.func @transform_8(%arg0: i32) -> (i32, i32, i32, i32) {
    %c0_i32 = arith.constant 0 : i32
    %c0_i32_0 = arith.constant 0 : i32
    %c0_i32_1 = arith.constant 0 : i32
    %c0_i32_2 = arith.constant 0 : i32
    return %arg0, %c0_i32, %c0_i32_0, %c0_i32_1 : i32, i32, i32, i32
  }
}

</mosaic_0001>

<bundles_post_ra>
// kernel: block_forward.1
= control target key start
LH: loop header
LB: loop body
LE: loop exit
PB: predicated region body
PF: predicated region fallthrough
CT: control target
= control target key end

     0   :  { %13 = vsyncpa [#allocation4], 0  ;;  %s4219_s0 = inlined_call_operand.vmem [shape: f32[2,256,8], index: 0, kind: input, shape index: {}]   ;;  %s4220_s1 = inlined_call_operand.vmem [shape: f32[8,128], index: 1, kind: input, shape index: {}]   ;;  %s4221_s2 = inlined_call_operand.vmem [shape: f32[9,128], index: 2, kind: input, shape index: {}]   ;;  %s4222_s3 = inlined_call_operand.vmem [shape: f32[128,16], index: 3, kind: input, shape index: {}]   ;;  %s4223_s4 = inlined_call_operand.vmem [shape: f32[2,16,128], index: 4, kind: input, shape index: {}]   ;;  %s4224_s5 = inlined_call_operand.vmem [shape: f32[2,9,128], index: 5, kind: input, shape index: {}]   ;;  %s4225_s6 = inlined_call_operand.vmem [shape: f32[2,128,16], index: 6, kind: input, shape index: {}]   ;;  %s4226_s7 = inlined_call_operand.vmem [shape: f32[9,128], index: 7, kind: input, shape index: {}]   ;;  %s4227_s8 = inlined_call_operand.hbm [shape: f32[2,8,8,16], index: 8, kind: output, shape index: {}]  }
   0x1   :  { %15 = vsyncpa [#allocation4 + $0x1], 0  ;;  %s3064_s27 = smov 0   ;;  %s3066_s28 = smov 0  }
   0x2   :  { %s3068_s29 = smov 0   ;;  %s3070_s30 = smov 0  }
   0x3 LB: > { %s3085_s9 = sadd.s32 4294967295, %s3013_s30   ;;  %s2340_s10 = sadd.s32 4294967294, %s3013_s30   ;;  %s3013_s30 = sphi %s3070_s30, %s4266_s30   ;;  %s3009_s29 = sphi %s3068_s29, %s4265_s29   ;;  %s3005_s28 = sphi %s3066_s28, %s4264_s28   ;;  %s3001_s27 = sphi %s3064_s27, %s4263_s27  }
   0x4   : > { %s3089_s11 = sadd.s32 1, %s3013_s30   ;;  %s201_s12 = sadd.s32 1, %s3009_s29 }
   0x5   : > { %s198_s13 = ssub.s32 %s3013_s30, %s3089_s11  ;;  %p211_p0 = scmp.ne.s32.totalorder %s3009_s29, %s3005_s28 }
   0x6   : > { %p199_p1 = scmp.eq.s32.totalorder %s198_s13, 0  ;;  %p212_p2 = scmp.eq.s32.totalorder %s3085_s9, 1 }
   0x7   : > { %p217_p3 = scmp.ne.s32.totalorder %s3005_s28, %s3001_s27  ;;  %p218_p4 = scmp.eq.s32.totalorder %s2340_s10, 1 }
   0x8   : > { %s3100_s14 = scalar_select %p199_p1, %s3009_s29, %s201_s12  }
   0x9   : > { %p3102_p5 = por %p212_p2, %p211_p0  ;;  %p3106_p6 = por %p218_p4, %p217_p3 }
   0xa   : > { %p2343_p7 = scmp.ge.s32.totalorder %s3013_s30, 1  ;;  %p265_p8 = scmp.lt.s32.totalorder %s3013_s30, 3 }
   0xc   : > { %p266_p9 = pnand %p2343_p7, %p265_p8 }
   0xe   : > { %269 = sbr.rel (%p266_p9) target bundleno = 1518 (0x5ee), region = 52 }
  0x15   : > { %v360_v0 = vld [vmem:[%s4220_s1] sm:$0xff]  ;;  %p299_p10 = scmp.lt.s32.totalorder %s3085_s9, 1  ;;  %vm366_vm0 = vcmask 64512   ;;  %v3015_v33 = vmov 0.0   ;;  %v1027_v35 = vld [vmem:[%s4222_s3 + $0x8] sm:$0xff]  ;;  %v1028_v37 = vld [vmem:[%s4222_s3 + $0x10] sm:$0xff] }
  0x16   : > { %2590 = vmatprep.subr.mxu0 %v360_v0  ;;  %313 = vst [vmem:[#allocation2 + $0x37] sm:$0x1] %v3015_v33  ;;  %304 = vst [vmem:[#allocation2] sm:$0xff] %v3015_v33  ;;  %v1026_v34 = vld [vmem:[%s4222_s3] sm:$0xff]  ;;  %v1029_v38 = vld [vmem:[%s4222_s3 + $0x18] sm:$0xff]  ;;  %vm1159_vm1 = vcmask 130048  }
  0x17   : > { %2591 = vmatpush3.msra.mxu0 %v360_v0  ;;  %s300_s19 = scalar_select %p299_p10, %s3085_s9, 1  ;;  %305 = vst [vmem:[#allocation2 + $0x8] sm:$0xff] %v3015_v33  ;;  %306 = vst [vmem:[#allocation2 + $0x10] sm:$0xff] %v3015_v33  ;;  %v2804_v36 = vpack.c.bf16 %v1027_v35, %v1026_v34  ;;  %v2808_v39 = vpack.c.bf16 %v1029_v38, %v1028_v37  ;;  %v1030_v40 = vld [vmem:[%s4222_s3 + $0x20] sm:$0xff]  ;;  %v1031_v41 = vld [vmem:[%s4222_s3 + $0x28] sm:$0xff] }
  0x18   : > { %308 = vst [vmem:[#allocation2 + $0xd8] sm:$0xff] %v3015_v33  ;;  %309 = vst [vmem:[#allocation2 + $0xe0] sm:$0xff] %v3015_v33  ;;  %v2812_v42 = vpack.c.bf16 %v1031_v41, %v1030_v40  ;;  %v1032_v43 = vld [vmem:[%s4222_s3 + $0x30] sm:$0xff]  ;;  %v1033_v44 = vld [vmem:[%s4222_s3 + $0x38] sm:$0xff]  ;;  %s296_s13 = sand.u32 1, %s3005_s28   ;;  %s2464_s21 = sshll.u32 %s3085_s9, 10 }
  0x19   : > { %s2463_s20 = sshll.u32 %s300_s19, 8  ;;  %310 = vst [vmem:[#allocation2 + $0xe8] sm:$0xff] %v3015_v33  ;;  %312 = vst [vmem:[#allocation2 + $0x1f] sm:$0x1] %v3015_v33  ;;  %2805 = vmatprep.subr.bf16.mxu1 %v2804_v36  ;;  %v2816_v45 = vpack.c.bf16 %v1033_v44, %v1032_v43  ;;  %v1034_v46 = vld [vmem:[%s4222_s3 + $0x40] sm:$0xff]  ;;  %v1035_v47 = vld [vmem:[%s4222_s3 + $0x48] sm:$0xff]  ;;  %s4170_s25 = scalar_lea.hbm %s4227_s8, %s2464_s21 }
  0x1a   : > { %s3120_s23 = scalar_lea.vmem %s4219_s0, %s2463_s20  ;;  %314 = vst [vmem:[#allocation2 + $0x4f] sm:$0x1] %v3015_v33  ;;  %315 = vst [vmem:[#allocation2 + $0x67] sm:$0x1] %v3015_v33  ;;  %2807 = vmatpush3.bf16.msra.mxu1 %v2804_v36  ;;  %v2820_v48 = vpack.c.bf16 %v1035_v47, %v1034_v46  ;;  %v1036_v49 = vld [vmem:[%s4222_s3 + $0x50] sm:$0xff]  ;;  %v1037_v50 = vld [vmem:[%s4222_s3 + $0x58] sm:$0xff] }
  0x1b   : > { %v328_v1 = vld [vmem:[%s3120_s23] sm:$0xff]  ;;  %v329_v2 = vld [vmem:[%s3120_s23 + $0x8] sm:$0xff]  ;;  %v330_v3 = vld [vmem:[%s3120_s23 + $0x10] sm:$0xff]  ;;  %316 = vst [vmem:[#allocation2 + $0x7f] sm:$0x1] %v3015_v33  ;;  %2809 = vmatprep.subr.bf16.mxu1 %v2808_v39  ;;  %v2824_v51 = vpack.c.bf16 %v1037_v50, %v1036_v49  ;;  %s2344_s17 = sshll.u32 %s296_s13, 6 }
  0x1c   : > { %2592 = vmatprep.mubr.msk.f32.mxu0 %vm366_vm0, %v328_v1  ;;  %v331_v4 = vld [vmem:[%s3120_s23 + $0x18] sm:$0xff]  ;;  %v332_v5 = vld [vmem:[%s3120_s23 + $0x20] sm:$0xff]  ;;  %v333_v6 = vld [vmem:[%s3120_s23 + $0x28] sm:$0xff]  ;;  %317 = vst [vmem:[#allocation2 + $0x97] sm:$0x1] %v3015_v33  ;;  %s298_s20 = scalar_lea.vmem [#allocation3], %s2344_s17 }
  0x1d   : > { %2593 = vmatmul.mubr.msk.f32.vlgmr.msra.gmra.mrb[0].mxu0 %vm366_vm0, %v329_v2  ;;  %v334_v7 = vld [vmem:[%s3120_s23 + $0x30] sm:$0xff]  ;;  %v335_v8 = vld [vmem:[%s3120_s23 + $0x38] sm:$0xff]  ;;  %v336_v9 = vld [vmem:[%s3120_s23 + $0x40] sm:$0xff]  ;;  %318 = vst [vmem:[#allocation2 + $0xaf] sm:$0x1] %v3015_v33  ;;  %s2278_s22 = sshll.u32 %s298_s20, 4  ;;  %s4172_s22 = int_to_ptr.vmem [resolvable:$true] %s2278_s22 }
  0x1e   : > { %2595 = vmatprep.mubr.msk.f32.mxu0 %vm366_vm0, %v330_v3  ;;  %v337_v10 = vld [vmem:[%s3120_s23 + $0x48] sm:$0xff]  ;;  %v338_v11 = vld [vmem:[%s3120_s23 + $0x50] sm:$0xff]  ;;  %v339_v12 = vld [vmem:[%s3120_s23 + $0x58] sm:$0xff]  ;;  %319 = vst [vmem:[#allocation2 + $0xc7] sm:$0x1] %v3015_v33  ;;  %2811 = vmatpush3.bf16.msra.mxu1 %v2808_v39  ;;  %s4178_s9 = scalar_lea.sflag [#allocation4], %s296_s13 }
  0x1f   : > { %v340_v13 = vld [vmem:[%s3120_s23 + $0x60] sm:$0xff]  ;;  %v341_v14 = vld [vmem:[%s3120_s23 + $0x68] sm:$0xff]  ;;  %v342_v15 = vld [vmem:[%s3120_s23 + $0x70] sm:$0xff]  ;;  %320 = vst [vmem:[#allocation2 + $0x28] sm:$0x1] %v3015_v33  ;;  %2813 = vmatprep.subr.bf16.mxu1 %v2812_v42  ;;  %s2951_s26 = scalar_lea.vmem %s4172_s22, 1024 }
  0x20   : > { %v343_v16 = vld [vmem:[%s3120_s23 + $0x78] sm:$0xff]  ;;  %v344_v17 = vld [vmem:[%s3120_s23 + $0x80] sm:$0xff]  ;;  %v345_v18 = vld [vmem:[%s3120_s23 + $0x88] sm:$0xff]  ;;  %321 = vst [vmem:[#allocation2 + $0x40] sm:$0x1] %v3015_v33  ;;  %p2952_p11 = scmp.ne.s32.totalorder %s4172_s22, %s2951_s26  ;;  %s3016_s10 = smov [#allocation3]  }
  0x21   : > { %2596 = vmatmul.mubr.msk.f32.gmra.mrb[2].mxu0 %vm366_vm0, %v331_v4  ;;  %v346_v19 = vld [vmem:[%s3120_s23 + $0x90] sm:$0xff]  ;;  %v347_v20 = vld [vmem:[%s3120_s23 + $0x98] sm:$0xff]  ;;  %v348_v21 = vld [vmem:[%s3120_s23 + $0xa0] sm:$0xff]  ;;  %322 = vst [vmem:[#allocation2 + $0x58] sm:$0x1] %v3015_v33  ;;  %s2955_s12 = sshll.u32 %s3016_s10, 4  ;;  %s2956_s12 = int_to_ptr.vmem [resolvable:$false] %s2955_s12 }
  0x22   : > { %2598 = vmatprep.mubr.msk.f32.mxu0 %vm366_vm0, %v332_v5  ;;  %v349_v22 = vld [vmem:[%s3120_s23 + $0xa8] sm:$0xff]  ;;  %v350_v23 = vld [vmem:[%s3120_s23 + $0xb0] sm:$0xff]  ;;  %v351_v24 = vld [vmem:[%s3120_s23 + $0xb8] sm:$0xff]  ;;  %323 = vst [vmem:[#allocation2 + $0x70] sm:$0x1] %v3015_v33  ;;  %2815 = vmatpush3.bf16.msra.mxu1 %v2812_v42  ;;  %p2953_p12 = pnand %p2952_p11, %p3102_p5  ;;  %s2957_s17 = scalar_lea.vmem %s2956_s12, 2048 }
  0x23   : > { %v352_v25 = vld [vmem:[%s3120_s23 + $0xc0] sm:$0xff]  ;;  %v353_v26 = vld [vmem:[%s3120_s23 + $0xc8] sm:$0xff]  ;;  %v354_v27 = vld [vmem:[%s3120_s23 + $0xd0] sm:$0xff]  ;;  %324 = vst [vmem:[#allocation2 + $0x88] sm:$0x1] %v3015_v33  ;;  %2817 = vmatprep.subr.bf16.mxu1 %v2816_v45  ;;  %p2958_p0 = scmp.lt.s32.totalorder %s4172_s22, %s2956_s12  ;;  %p2959_p1 = scmp.lt.s32.totalorder %s2957_s17, %s2951_s26 }
  0x24   : > { %v355_v28 = vld [vmem:[%s3120_s23 + $0xd8] sm:$0xff]  ;;  %v356_v29 = vld [vmem:[%s3120_s23 + $0xe0] sm:$0xff]  ;;  %v357_v30 = vld [vmem:[%s3120_s23 + $0xe8] sm:$0xff]  ;;  %325 = vst [vmem:[#allocation2 + $0xa0] sm:$0x1] %v3015_v33  ;;  %p2954_p13 = pneg %p2953_p12 }
  0x25   : > { %2599 = vmatmul.mubr.msk.f32.gmra.mrb[4].mxu0 %vm366_vm0, %v333_v6  ;;  %v358_v31 = vld [vmem:[%s3120_s23 + $0xf0] sm:$0xff]  ;;  %v359_v32 = vld [vmem:[%s3120_s23 + $0xf8] sm:$0xff]  ;;  %326 = vst [vmem:[#allocation2 + $0xb8] sm:$0x1] %v3015_v33  ;;  %327 = vst [vmem:[#allocation2 + $0xd0] sm:$0x1] %v3015_v33  ;;  %p2960_p2 = por %p2959_p1, %p2958_p0 }
  0x26   : > { %2601 = vmatprep.mubr.msk.f32.mxu0 %vm366_vm0, %v334_v7  ;;  %2819 = vmatpush3.bf16.msra.mxu1 %v2816_v45  ;;  %v1038_v52 = vld [vmem:[%s4222_s3 + $0x60] sm:$0xff]  ;;  %v1039_v53 = vld [vmem:[%s4222_s3 + $0x68] sm:$0xff]  ;;  %v1040_v55 = vld [vmem:[%s4222_s3 + $0x70] sm:$0xff] }
  0x27   : > { %2821 = vmatprep.subr.bf16.mxu1 %v2820_v48  ;;  %v2828_v54 = vpack.c.bf16 %v1039_v53, %v1038_v52  ;;  %v1041_v56 = vld [vmem:[%s4222_s3 + $0x78] sm:$0xff]  ;;  %v1152_v58 = vld [vmem:[%s4223_s4] sm:$0xff]  ;;  %v1153_v59 = vld [vmem:[%s4223_s4 + $0x8] sm:$0xff]  ;;  %p2961_p3 = pnand %p2960_p2, %p2954_p13 }
  0x28   : > { %v2832_v57 = vpack.c.bf16 %v1041_v56, %v1040_v55  ;;  %v3240_v60 = vpack.c.bf16 %v1153_v59, %v1152_v58  ;;  %v3246_v1 = vld [vmem:[%s4226_s7] ss:$0 sm:$0xff] }
  0x29   : > { %2602 = vmatmul.mubr.msk.f32.gmra.mrb[6].mxu0 %vm366_vm0, %v335_v8 }
  0x2a   : > { %2604 = vmatprep.mubr.msk.f32.mxu0 %vm366_vm0, %v336_v9  ;;  %2823 = vmatpush3.bf16.msra.mxu1 %v2820_v48 }
  0x2b   : > { %2825 = vmatprep.subr.bf16.mxu1 %v2824_v51 }
  0x2d   : > { %2605 = vmatmul.mubr.msk.f32.gmra.mrb[8].mxu0 %vm366_vm0, %v337_v10 }
  0x2e   : > { %2607 = vmatprep.mubr.msk.f32.mxu0 %vm366_vm0, %v338_v11  ;;  %2827 = vmatpush3.bf16.msra.mxu1 %v2824_v51 }
  0x2f   : > { %2829 = vmatprep.subr.bf16.mxu1 %v2828_v54 }
  0x31   : > { %2608 = vmatmul.mubr.msk.f32.gmra.mrb[10].mxu0 %vm366_vm0, %v339_v12 }
  0x32   : > { %2610 = vmatprep.mubr.msk.f32.mxu0 %vm366_vm0, %v340_v13  ;;  %2831 = vmatpush3.bf16.msra.mxu1 %v2828_v54 }
  0x33   : > { %2833 = vmatprep.subr.bf16.mxu1 %v2832_v57 }
  0x35   : > { %2611 = vmatmul.mubr.msk.f32.gmra.mrb[12].mxu0 %vm366_vm0, %v341_v14 }
  0x36   : > { %2613 = vmatprep.mubr.msk.f32.mxu0 %vm366_vm0, %v342_v15  ;;  %2835 = vmatpush3.bf16.msra.mxu1 %v2832_v57 }
  0x37   : > { %2837 = vmatprep.subr.bf16.mxu1 %v3240_v60 }
  0x39   : > { %2614 = vmatmul.mubr.msk.f32.gmra.mrb[14].mxu0 %vm366_vm0, %v343_v16 }
  0x3a   : > { %2616 = vmatprep.mubr.msk.f32.mxu0 %vm366_vm0, %v344_v17  ;;  %v3256_v17 = vld [vmem:[%s4221_s2 + $0x4] ss:$0 sm:$0xff] }
  0x3d   : > { %2617 = vmatmul.mubr.msk.f32.gmra.mrb[16].mxu0 %vm366_vm0, %v345_v18 }
  0x3e   : > { %2619 = vmatprep.mubr.msk.f32.mxu0 %vm366_vm0, %v346_v19 }
  0x41   : > { %2620 = vmatmul.mubr.msk.f32.gmra.mrb[18].mxu0 %vm366_vm0, %v347_v20 }
  0x42   : > { %2622 = vmatprep.mubr.msk.f32.mxu0 %vm366_vm0, %v348_v21 }
  0x45   : > { %2623 = vmatmul.mubr.msk.f32.gmra.mrb[20].mxu0 %vm366_vm0, %v349_v22 }
  0x46   : > { %2625 = vmatprep.mubr.msk.f32.mxu0 %vm366_vm0, %v350_v23 }
  0x49   : > { %2626 = vmatmul.mubr.msk.f32.gmra.mrb[22].mxu0 %vm366_vm0, %v351_v24  ;;  %v3264_v24 = vld [vmem:[%s4221_s2 + $0x5] ss:$0 sm:$0xff] }
  0x4a   : > { %2628 = vmatprep.mubr.msk.f32.mxu0 %vm366_vm0, %v352_v25 }
  0x4d   : > { %2629 = vmatmul.mubr.msk.f32.gmra.mrb[24].mxu0 %vm366_vm0, %v353_v26 }
  0x4e   : > { %2631 = vmatprep.mubr.msk.f32.mxu0 %vm366_vm0, %v354_v27 }
  0x51   : > { %2632 = vmatmul.mubr.msk.f32.gmra.mrb[26].mxu0 %vm366_vm0, %v355_v28 }
  0x52   : > { %2634 = vmatprep.mubr.msk.f32.mxu0 %vm366_vm0, %v356_v29 }
  0x55   : > { %2635 = vmatmul.mubr.msk.f32.gmra.mrb[28].mxu0 %vm366_vm0, %v357_v30 }
  0x56   : > { %2637 = vmatprep.mubr.msk.f32.mxu0 %vm366_vm0, %v358_v31 }
  0x59   : > { %2638 = vmatmul.mubr.msk.f32.gmra.mrb[30].mxu0 %vm366_vm0, %v359_v32 }
  0xf0   : > { %v2594_v61 = vpop.f32.mrb[0].mxu0 }
  0xf1   : > { %v529_v62 = vpop.f32.mrb[1].mxu0  ;;  %v535_v3 = vadd.f32 %v2594_v61, %v3246_v1 }
  0xf2   : > { %v530_v5 = vadd.f32 %v3246_v1, %v529_v62 }
  0xf3   : > { %v689_v7 = vmax.f32 %v535_v3, 0.0 }
  0xf4   : > { %v2597_v63 = vpop.f32.mrb[2].mxu0  ;;  %v688_v10 = vmax.f32 %v530_v5, 0.0 }
  0xf5   : > { %v539_v0 = vpop.f32.mrb[3].mxu0  ;;  %v545_v8 = vadd.f32 %v2597_v63, %v3246_v1  ;;  %v721_v13 = vmin.f32 %v689_v7, 6.0 }
  0xf6   : > { %v540_v11 = vadd.f32 %v3246_v1, %v539_v0  ;;  %v720_v18 = vmin.f32 %v688_v10, 6.0 }
  0xf7   : > { %v691_v14 = vmax.f32 %v545_v8, 0.0  ;;  %v758_v27 = vmul.f32 %v3256_v17, %v721_v13 }
  0xf8   : > { %v2600_v2 = vpop.f32.mrb[4].mxu0  ;;  %v690_v19 = vmax.f32 %v540_v11, 0.0  ;;  %v757_v32 = vmul.f32 %v3256_v17, %v720_v18 }
  0xf9   : > { %v549_v4 = vpop.f32.mrb[5].mxu0  ;;  %v555_v21 = vadd.f32 %v2600_v2, %v3246_v1  ;;  %v723_v28 = vmin.f32 %v691_v14, 6.0 }
  0xfa   : > { %v550_v23 = vadd.f32 %v3246_v1, %v549_v4  ;;  %v722_v33 = vmin.f32 %v690_v19, 6.0 }
  0xfb   : > { %v693_v36 = vmax.f32 %v555_v21, 0.0  ;;  %v760_v45 = vmul.f32 %v3256_v17, %v723_v28 }
  0xfc   : > { %v2603_v6 = vpop.f32.mrb[6].mxu0  ;;  %v692_v40 = vmax.f32 %v550_v23, 0.0  ;;  %v759_v50 = vmul.f32 %v3256_v17, %v722_v33 }
  0xfd   : > { %v559_v9 = vpop.f32.mrb[7].mxu0  ;;  %v565_v37 = vadd.f32 %v2603_v6, %v3246_v1  ;;  %v725_v54 = vmin.f32 %v693_v36, 6.0 }
  0xfe   : > { %v560_v41 = vadd.f32 %v3246_v1, %v559_v9  ;;  %v724_v58 = vmin.f32 %v692_v40, 6.0 }
  0xff   : > { %v695_v55 = vmax.f32 %v565_v37, 0.0  ;;  %v762_v8 = vmul.f32 %v3256_v17, %v725_v54 }
 0x100   : > { %v2606_v12 = vpop.f32.mrb[8].mxu0  ;;  %v694_v59 = vmax.f32 %v560_v41, 0.0 }
 0x101   : > { %v575_v15 = vadd.f32 %v2606_v12, %v3246_v1  ;;  %v569_v16 = vpop.f32.mrb[9].mxu0  ;;  %v727_v9 = vmin.f32 %v695_v55, 6.0  ;;  %v761_v12 = vmul.f32 %v3256_v17, %v724_v58 }
 0x102   : > { %v570_v20 = vadd.f32 %v3246_v1, %v569_v16  ;;  %v726_v13 = vmin.f32 %v694_v59, 6.0 }
 0x103   : > { %v697_v22 = vmax.f32 %v575_v15, 0.0 }
 0x104   : > { %v696_v25 = vmax.f32 %v570_v20, 0.0  ;;  %v2609_v26 = vpop.f32.mrb[10].mxu0 }
 0x105   : > { %v729_v29 = vmin.f32 %v697_v22, 6.0  ;;  %v585_v30 = vadd.f32 %v2609_v26, %v3246_v1  ;;  %v579_v31 = vpop.f32.mrb[11].mxu0  ;;  %v764_v26 = vmul.f32 %v3256_v17, %v727_v9 }
 0x106   : > { %v728_v34 = vmin.f32 %v696_v25, 6.0  ;;  %v580_v35 = vadd.f32 %v3246_v1, %v579_v31  ;;  %v3305_v31 = vld [vmem:[%s4221_s2 + $0x7] ss:$0 sm:$0xff] }
 0x107   : > { %v771_v38 = vmul.f32 %v3264_v24, %v729_v29  ;;  %829 = vst [vmem:[#allocation2 + $0x38] sm:$0xff] %v729_v29  ;;  %v699_v39 = vmax.f32 %v585_v30, 0.0  ;;  %v763_v29 = vmul.f32 %v3256_v17, %v726_v13 }
 0x108   : > { %v770_v42 = vmul.f32 %v3264_v24, %v728_v34  ;;  %828 = vst [vmem:[#allocation2 + $0x20] sm:$0xff] %v728_v34  ;;  %v698_v43 = vmax.f32 %v580_v35, 0.0  ;;  %v2612_v44 = vpop.f32.mrb[12].mxu0 }
 0x109   : > { %v3275_v46 = vadd.f32 %v771_v38, %v758_v27  ;;  %v731_v47 = vmin.f32 %v699_v39, 6.0  ;;  %v595_v48 = vadd.f32 %v2612_v44, %v3246_v1  ;;  %v589_v49 = vpop.f32.mrb[13].mxu0 }
 0x10a   : > { %v3279_v51 = vadd.f32 %v770_v42, %v757_v32  ;;  %v730_v52 = vmin.f32 %v698_v43, 6.0  ;;  %v590_v53 = vadd.f32 %v3246_v1, %v589_v49 }
 0x10b   : > { %v773_v56 = vmul.f32 %v3264_v24, %v731_v47  ;;  %831 = vst [vmem:[#allocation2 + $0x68] sm:$0xff] %v731_v47  ;;  %v701_v57 = vmax.f32 %v595_v48, 0.0 }
 0x10c   : > { %v772_v61 = vmul.f32 %v3264_v24, %v730_v52  ;;  %830 = vst [vmem:[#allocation2 + $0x50] sm:$0xff] %v730_v52  ;;  %v700_v62 = vmax.f32 %v590_v53, 0.0  ;;  %v2615_v63 = vpop.f32.mrb[14].mxu0 }
 0x10d   : > { %v781_v0 = vadd.f32 %v773_v56, %v760_v45  ;;  %v733_v2 = vmin.f32 %v701_v57, 6.0  ;;  %v605_v3 = vadd.f32 %v2615_v63, %v3246_v1  ;;  %v599_v4 = vpop.f32.mrb[15].mxu0  ;;  %v3339_v63 = vld [vmem:[#allocation2 + $0x7] sm:$0xff] }
 0x10e   : > { %v3285_v5 = vadd.f32 %v772_v61, %v759_v50  ;;  %v732_v6 = vmin.f32 %v700_v62, 6.0  ;;  %v600_v7 = vadd.f32 %v3246_v1, %v599_v4  ;;  %v837_v57 = vld [vmem:[#allocation2 + $0x37] sm:$0xff]  ;;  %v2384_v62 = vld [vmem:[%s4221_s2 + $0x3] ss:$0 sm:$0xff] }
 0x10f   : > { %v775_v10 = vmul.f32 %v3264_v24, %v733_v2  ;;  %833 = vst [vmem:[#allocation2 + $0x98] sm:$0xff] %v733_v2  ;;  %v703_v11 = vmax.f32 %v605_v3, 0.0  ;;  %v836_v2 = vld [vmem:[#allocation2 + $0x1f] sm:$0xff] }
 0x110   : > { %v774_v14 = vmul.f32 %v3264_v24, %v732_v6  ;;  %832 = vst [vmem:[#allocation2 + $0x80] sm:$0xff] %v732_v6  ;;  %v702_v15 = vmax.f32 %v600_v7, 0.0  ;;  %v2618_v16 = vpop.f32.mrb[16].mxu0  ;;  %v3353_v7 = vld [vmem:[%s4221_s2 + $0x2] ss:$0 sm:$0xff] }
 0x111   : > { %v3292_v18 = vadd.f32 %v775_v10, %v762_v8  ;;  %v735_v19 = vmin.f32 %v703_v11, 6.0  ;;  %v615_v20 = vadd.f32 %v2618_v16, %v3246_v1  ;;  %v609_v21 = vpop.f32.mrb[17].mxu0  ;;  %v3361_v11 = vmul.f32 0.0, %v3353_v7 }
 0x112   : > { %v3295_v22 = vadd.f32 %v774_v14, %v761_v12  ;;  %v734_v23 = vmin.f32 %v702_v15, 6.0  ;;  %v610_v25 = vadd.f32 %v3246_v1, %v609_v21  ;;  %v839_v8 = vld [vmem:[#allocation2 + $0x67] sm:$0xff]  ;;  %v3366_v12 = vld [vmem:[%s4221_s2] ss:$0 sm:$0xff] }
 0x113   : > { %v777_v27 = vmul.f32 %v3264_v24, %v735_v19  ;;  %835 = vst [vmem:[#allocation2 + $0xc8] sm:$0xff] %v735_v19  ;;  %v705_v28 = vmax.f32 %v615_v20, 0.0  ;;  %v838_v13 = vld [vmem:[#allocation2 + $0x4f] sm:$0xff]  ;;  %v850_v19 = vmul.f32 %v2384_v62, %v837_v57  ;;  %v3371_v20 = vmul.f32 %v3366_v12, %v3339_v63 }
 0x114   : > { %v776_v30 = vmul.f32 %v3264_v24, %v734_v23  ;;  %834 = vst [vmem:[#allocation2 + $0xb0] sm:$0xff] %v734_v23  ;;  %v704_v32 = vmax.f32 %v610_v25, 0.0  ;;  %v2621_v33 = vpop.f32.mrb[18].mxu0 }
 0x115   : > { %v3307_v34 = vadd.f32 %v777_v27, %v764_v26  ;;  %v737_v35 = vmin.f32 %v705_v28, 6.0  ;;  %v625_v36 = vadd.f32 %v2621_v33, %v3246_v1  ;;  %v619_v37 = vpop.f32.mrb[19].mxu0  ;;  %v849_v28 = vmul.f32 %v2384_v62, %v836_v2 }
 0x116   : > { %v3310_v38 = vadd.f32 %v776_v30, %v763_v29  ;;  %v736_v39 = vmin.f32 %v704_v32, 6.0  ;;  %v620_v17 = vadd.f32 %v3246_v1, %v619_v37  ;;  %v841_v23 = vld [vmem:[#allocation2 + $0x97] sm:$0xff] }
 0x117   : > { %v792_v24 = vmul.f32 %v3305_v31, %v737_v35  ;;  %v707_v40 = vmax.f32 %v625_v36, 0.0  ;;  %v840_v30 = vld [vmem:[#allocation2 + $0x7f] sm:$0xff]  ;;  %v3381_v36 = vmul.f32 %v2384_v62, %v839_v8 }
 0x118   : > { %v791_v41 = vmul.f32 %v3305_v31, %v736_v39  ;;  %v706_v42 = vmax.f32 %v620_v17, 0.0  ;;  %v2624_v43 = vpop.f32.mrb[20].mxu0 }
 0x119   : > { %v3316_v44 = vadd.f32 %v792_v24, %v3275_v46  ;;  %v3318_v45 = vmin.f32 %v707_v40, 6.0  ;;  %v635_v47 = vadd.f32 %v2624_v43, %v3246_v1  ;;  %v629_v48 = vpop.f32.mrb[21].mxu0 }
 0x11a   : > { %v3322_v49 = vadd.f32 %v791_v41, %v3279_v51  ;;  %v3324_v50 = vmin.f32 %v706_v42, 6.0  ;;  %v630_v52 = vadd.f32 %v3246_v1, %v629_v48  ;;  %v843_v40 = vld [vmem:[#allocation2 + $0xc7] sm:$0xff]  ;;  %v3396_v48 = vmul.f32 %v2384_v62, %v841_v23 }
 0x11b   : > { %v794_v53 = vmul.f32 %v3305_v31, %v3318_v45  ;;  %v709_v54 = vmax.f32 %v635_v47, 0.0  ;;  %v3415_v2 = vmul.f32 %v2384_v62, %v843_v40 }
 0x11c   : > { %v793_v46 = vmul.f32 %v3305_v31, %v3324_v50  ;;  %v708_v55 = vmax.f32 %v630_v52, 0.0  ;;  %v2627_v56 = vpop.f32.mrb[22].mxu0 }
 0x11d   : > { %v3331_v58 = vadd.f32 %v794_v53, %v781_v0  ;;  %v3333_v59 = vmin.f32 %v709_v54, 6.0  ;;  %v645_v51 = vadd.f32 %v2627_v56, %v3246_v1  ;;  %v639_v61 = vpop.f32.mrb[23].mxu0  ;;  %v3348_v0 = vld [vmem:[%s4221_s2 + $0x1] ss:$0 sm:$0xff]  ;;  %v842_v53 = vld [vmem:[#allocation2 + $0xaf] sm:$0xff] }
 0x11e   : > { %v3342_v3 = vadd.f32 %v793_v46, %v3285_v5  ;;  %v740_v4 = vmin.f32 %v708_v55, 6.0  ;;  %v640_v6 = vadd.f32 %v3246_v1, %v639_v61  ;;  %v3358_v5 = vmul.f32 0.0, %v3348_v0 }
 0x11f   : > { %v796_v9 = vmul.f32 %v3305_v31, %v3333_v59  ;;  %v711_v10 = vmax.f32 %v645_v51, 0.0  ;;  %v3387_v24 = vmul.f32 %v3348_v0, %v737_v35  ;;  %v887_v42 = vmul.f32 %v3348_v0, %v736_v39 }
 0x120   : > { %v795_v14 = vmul.f32 %v3305_v31, %v740_v4  ;;  %v710_v15 = vmax.f32 %v640_v6, 0.0  ;;  %v2630_v16 = vpop.f32.mrb[24].mxu0  ;;  %v3410_v57 = vmul.f32 %v3348_v0, %v3318_v45  ;;  %v889_v61 = vmul.f32 %v3348_v0, %v3324_v50 }
 0x121   : > { %v3374_v21 = vadd.f32 %v796_v9, %v3292_v18  ;;  %v743_v25 = vmin.f32 %v711_v10, 6.0  ;;  %v655_v26 = vadd.f32 %v2630_v16, %v3246_v1  ;;  %v649_v27 = vpop.f32.mrb[25].mxu0  ;;  %v3384_v18 = vmul.f32 %v2384_v62, %v838_v13 }
 0x122   : > { %v3378_v29 = vadd.f32 %v795_v14, %v3295_v22  ;;  %v742_v32 = vmin.f32 %v710_v15, 6.0  ;;  %v650_v33 = vadd.f32 %v3246_v1, %v649_v27  ;;  %v3393_v22 = vld [vmem:[%s4221_s2 + $0x8] ss:$0 sm:$0xff]  ;;  %v3418_v9 = vmul.f32 %v2384_v62, %v842_v53 }
 0x123   : > { %v798_v37 = vmul.f32 %v3305_v31, %v743_v25  ;;  %v713_v17 = vmax.f32 %v655_v26, 0.0  ;;  %v3422_v45 = vmul.f32 %v3348_v0, %v3333_v59  ;;  %v891_v50 = vmul.f32 %v3348_v0, %v740_v4 }
 0x124   : > { %v797_v41 = vmul.f32 %v3305_v31, %v742_v32  ;;  %v712_v43 = vmax.f32 %v650_v33, 0.0  ;;  %v2633_v47 = vpop.f32.mrb[26].mxu0  ;;  %v3402_v31 = vmul.f32 %v2384_v62, %v840_v30  ;;  %v3434_v25 = vmul.f32 %v3348_v0, %v742_v32  ;;  %v3448_v0 = vld [vmem:[%s4221_s2 + $0x6] ss:$0 sm:$0xff] }
 0x125   : > { %v3399_v52 = vadd.f32 %v798_v37, %v3307_v34  ;;  %v745_v35 = vmin.f32 %v713_v17, 6.0  ;;  %v665_v54 = vadd.f32 %v2633_v47, %v3246_v1  ;;  %v659_v46 = vpop.f32.mrb[27].mxu0 }
 0x126   : > { %v3405_v55 = vadd.f32 %v797_v41, %v3310_v38  ;;  %v744_v56 = vmin.f32 %v712_v43, 6.0  ;;  %v660_v39 = vadd.f32 %v3246_v1, %v659_v46 }
 0x127   : > { %v813_v34 = vmul.f32 %v3393_v22, %v745_v35  ;;  %903 = vst [vmem:[#allocation2 + $0x38] sm:$0xff] %v745_v35  ;;  %v715_v51 = vmax.f32 %v665_v54, 0.0  ;;  %v3440_v27 = vmul.f32 %v3353_v7, %v745_v35 }
 0x128   : > { %v812_v6 = vmul.f32 %v3393_v22, %v744_v56  ;;  %902 = vst [vmem:[#allocation2 + $0x20] sm:$0xff] %v744_v56  ;;  %v714_v38 = vmax.f32 %v660_v39, 0.0  ;;  %v2636_v8 = vpop.f32.mrb[28].mxu0 }
 0x129   : > { %v821_v10 = vadd.f32 %v813_v34, %v3316_v44  ;;  %v3425_v13 = vmin.f32 %v715_v51, 6.0  ;;  %v675_v14 = vadd.f32 %v2636_v8, %v3246_v1  ;;  %v669_v15 = vpop.f32.mrb[29].mxu0 }
 0x12a   : > { %v820_v16 = vadd.f32 %v812_v6, %v3322_v49  ;;  %v3430_v23 = vmin.f32 %v714_v38, 6.0  ;;  %v670_v62 = vadd.f32 %v3246_v1, %v669_v15 }
 0x12b   : > { %v858_v59 = vadd.f32 %v850_v19, %v821_v10  ;;  %v815_v44 = vmul.f32 %v3393_v22, %v3425_v13  ;;  %905 = vst [vmem:[#allocation2 + $0x68] sm:$0xff] %v3425_v13  ;;  %v717_v26 = vmax.f32 %v675_v14, 0.0  ;;  %v953_v19 = vmul.f32 %v3353_v7, %v744_v56 }
 0x12c   : > { %v857_v4 = vadd.f32 %v849_v28, %v820_v16  ;;  %v814_v49 = vmul.f32 %v3393_v22, %v3430_v23  ;;  %904 = vst [vmem:[#allocation2 + $0x50] sm:$0xff] %v3430_v23  ;;  %v716_v30 = vmax.f32 %v670_v62, 0.0  ;;  %v2639_v33 = vpop.f32.mrb[30].mxu0 }
 0x12d   : > { %v895_v32 = vadd.f32 %v887_v42, %v858_v59  ;;  %v823_v37 = vadd.f32 %v815_v44, %v3331_v58  ;;  %v3452_v17 = vmin.f32 %v717_v26, 6.0  ;;  %v685_v28 = vadd.f32 %v2639_v33, %v3246_v1  ;;  %v679_v40 = vpop.f32.mrb[31].mxu0 }
 0x12e   : > { %v822_v41 = vadd.f32 %v814_v49, %v3342_v3  ;;  %v3456_v43 = vmin.f32 %v716_v30, 6.0  ;;  %v680_v47 = vadd.f32 %v3246_v1, %v679_v40  ;;  %v894_v53 = vadd.f32 %v3358_v5, %v857_v4  ;;  %v911_v35 = vld [vmem:[#allocation2 + $0x37] sm:$0xff] }
 0x12f   : > { %v860_v54 = vadd.f32 %v3381_v36, %v823_v37  ;;  %v817_v42 = vmul.f32 %v3393_v22, %v3452_v17  ;;  %907 = vst [vmem:[#allocation2 + $0x98] sm:$0xff] %v3452_v17  ;;  %v719_v58 = vmax.f32 %v685_v28, 0.0  ;;  %v910_v46 = vld [vmem:[#allocation2 + $0x1f] sm:$0xff]  ;;  %v924_v56 = vmul.f32 %v3448_v0, %v911_v35 }
 0x130   : > { %v859_v3 = vadd.f32 %v3384_v18, %v822_v41  ;;  %v816_v39 = vmul.f32 %v3393_v22, %v3456_v43  ;;  %906 = vst [vmem:[#allocation2 + $0x80] sm:$0xff] %v3456_v43  ;;  %v718_v1 = vmax.f32 %v680_v47, 0.0  ;;  %v923_v5 = vmul.f32 %v3448_v0, %v910_v46 }
 0x131   : > { %v897_v36 = vadd.f32 %v889_v61, %v860_v54  ;;  %v825_v34 = vadd.f32 %v817_v42, %v3374_v21  ;;  %v751_v51 = vmin.f32 %v719_v58, 6.0  ;;  %v932_v6 = vadd.f32 %v924_v56, %v895_v32 }
 0x132   : > { %v896_v38 = vadd.f32 %v3387_v24, %v859_v3  ;;  %v824_v8 = vadd.f32 %v816_v39, %v3378_v29  ;;  %v3473_v10 = vmin.f32 %v718_v1, 6.0  ;;  %v931_v18 = vadd.f32 %v923_v5, %v894_v53  ;;  %v3486_v24 = vld [vmem:[%s4226_s7 + $0x1] ss:$0 sm:$0xff]  ;;  %v913_v44 = vld [vmem:[#allocation2 + $0x67] sm:$0xff] }
 0x133   : > { %v862_v14 = vadd.f32 %v3396_v48, %v825_v34  ;;  %v819_v15 = vmul.f32 %v3393_v22, %v751_v51  ;;  %909 = vst [vmem:[#allocation2 + $0xc8] sm:$0xff] %v751_v51  ;;  %v961_v16 = vadd.f32 %v953_v19, %v932_v6  ;;  %v982_v62 = vmul.f32 %v3366_v12, %v910_v46  ;;  %v912_v61 = vld [vmem:[#allocation2 + $0x4f] sm:$0xff] }
 0x134   : > { %v861_v21 = vadd.f32 %v3402_v31, %v824_v8  ;;  %v818_v59 = vmul.f32 %v3393_v22, %v3473_v10  ;;  %908 = vst [vmem:[#allocation2 + $0xb0] sm:$0xff] %v3473_v10  ;;  %v960_v29 = vadd.f32 %v3361_v11, %v931_v18  ;;  %v925_v48 = vmul.f32 %v3448_v0, %v912_v61 }
 0x135   : > { %v899_v26 = vadd.f32 %v891_v50, %v862_v14  ;;  %v827_v4 = vadd.f32 %v819_v15, %v3399_v52  ;;  %v990_v49 = vadd.f32 %v982_v62, %v961_v16  ;;  %v956_v31 = vmul.f32 %v3353_v7, %v3425_v13 }
 0x136   : > { %v898_v22 = vadd.f32 %v3410_v57, %v861_v21  ;;  %v826_v30 = vadd.f32 %v818_v59, %v3405_v55  ;;  %v989_v11 = vadd.f32 %v3371_v20, %v960_v29  ;;  %v933_v33 = vadd.f32 %v925_v48, %v896_v38  ;;  %v915_v40 = vld [vmem:[#allocation2 + $0x97] sm:$0xff] }
 0x137   : > { %v864_v19 = vadd.f32 %v3415_v2, %v827_v4  ;;  %v1003_v32 = vadd.f32 %v3486_v24, %v990_v49  ;;  %v983_v37 = vmul.f32 %v3366_v12, %v911_v35  ;;  %v926_v50 = vmul.f32 %v3448_v0, %v913_v44  ;;  %v914_v52 = vld [vmem:[#allocation2 + $0x7f] sm:$0xff] }
 0x138   : > { %v863_v28 = vadd.f32 %v3418_v9, %v826_v30  ;;  %v1002_v13 = vadd.f32 %v3486_v24, %v989_v11  ;;  %v962_v57 = vadd.f32 %v3440_v27, %v933_v33  ;;  %v927_v55 = vmul.f32 %v3448_v0, %v914_v52 }
 0x139   : > { %v901_v20 = vadd.f32 %v3434_v25, %v864_v19  ;;  %v1011_v41 = vmax.f32 %v1003_v32, 0.0  ;;  %v934_v2 = vadd.f32 %v926_v50, %v897_v36  ;;  %v955_v47 = vmul.f32 %v3353_v7, %v3430_v23  ;;  %v1562_v50 = vld [vmem:[%s4225_s6 + $0x8] sm:$0xff] }
 0x13a   : > { %v900_v53 = vadd.f32 %v3422_v45, %v863_v28  ;;  %v1010_v35 = vmax.f32 %v1002_v13, 0.0  ;;  %v991_v54 = vadd.f32 %v983_v37, %v962_v57  ;;  %v935_v42 = vadd.f32 %v927_v55, %v898_v22  ;;  %v917_v3 = vld [vmem:[#allocation2 + $0xc7] sm:$0xff]  ;;  %v1564_v28 = vld [vmem:[%s4225_s6 + $0x18] sm:$0xff] }
 0x13b   : > { %v963_v9 = vadd.f32 %v955_v47, %v934_v2  ;;  %v984_v58 = vmul.f32 %v3366_v12, %v912_v61  ;;  %v985_v27 = vmul.f32 %v3366_v12, %v913_v44  ;;  %v928_v46 = vmul.f32 %v3448_v0, %v915_v40  ;;  %v916_v56 = vld [vmem:[#allocation2 + $0xaf] sm:$0xff]  ;;  %v1561_v37 = vld [vmem:[%s4225_s6] sm:$0xff] }
 0x13c   : > { %v1018_v25 = vmin.f32 %v1010_v35, 6.0  ;;  %v1019_v39 = vmin.f32 %v1011_v41, 6.0  ;;  %v1004_v1 = vadd.f32 %v3486_v24, %v991_v54  ;;  %v964_v5 = vadd.f32 %v956_v31, %v935_v42  ;;  %v1565_v57 = vld [vmem:[%s4225_s6 + $0x20] sm:$0xff]  ;;  %v1566_v55 = vld [vmem:[%s4225_s6 + $0x28] sm:$0xff] }
 0x13d   : > { %v992_v23 = vadd.f32 %v984_v58, %v963_v9  ;;  %v936_v36 = vadd.f32 %v928_v46, %v899_v26  ;;  %v957_v45 = vmul.f32 %v3353_v7, %v3456_v43  ;;  %v929_v34 = vmul.f32 %v3448_v0, %v916_v56 }
 0x13e   : > { %2672 = vmatprep.mubr.f32.mxu1 %v1018_v25  ;;  %v1012_v51 = vmax.f32 %v1004_v1, 0.0  ;;  %v993_v6 = vadd.f32 %v985_v27, %v964_v5  ;;  %v986_v38 = vmul.f32 %v3366_v12, %v914_v52  ;;  %v930_v8 = vmul.f32 %v3448_v0, %v917_v3  ;;  %v1567_v5 = vld [vmem:[%s4225_s6 + $0x30] sm:$0xff] }
 0x13f   : > { %2673 = vmatmul.mubr.f32.vlgmr.msra.gmra.mrb[0].mxu1 %v1019_v39  ;;  %v1005_v18 = vadd.f32 %v3486_v24, %v992_v23  ;;  %v965_v14 = vadd.f32 %v957_v45, %v936_v36  ;;  %v937_v15 = vadd.f32 %v929_v34, %v900_v53  ;;  %v958_v16 = vmul.f32 %v3353_v7, %v3452_v17  ;;  %v1568_v23 = vld [vmem:[%s4225_s6 + $0x38] sm:$0xff]  ;;  %v1569_v45 = vld [vmem:[%s4225_s6 + $0x40] sm:$0xff]  ;;  %v1570_v34 = vld [vmem:[%s4225_s6 + $0x48] sm:$0xff] }
 0x140   : > { %v1020_v62 = vmin.f32 %v1012_v51, 6.0  ;;  %v1006_v43 = vadd.f32 %v3486_v24, %v993_v6  ;;  %v938_v61 = vadd.f32 %v930_v8, %v901_v20  ;;  %v959_v21 = vmul.f32 %v3353_v7, %v3473_v10  ;;  %2839 = vmatpush3.bf16.msra.mxu1 %v3240_v60  ;;  %v2390_v20 = vld [vmem:[%s4226_s7 + $0x2] ss:$0 sm:$0xff]  ;;  %v1571_v6 = vld [vmem:[%s4225_s6 + $0x50] sm:$0xff] }
 0x141   : > { %v1013_v59 = vmax.f32 %v1005_v18, 0.0  ;;  %v994_v29 = vadd.f32 %v986_v38, %v965_v14  ;;  %v966_v0 = vadd.f32 %v958_v16, %v937_v15  ;;  %v987_v48 = vmul.f32 %v3366_v12, %v915_v40  ;;  %v1572_v38 = vld [vmem:[%s4225_s6 + $0x58] sm:$0xff]  ;;  %v1573_v8 = vld [vmem:[%s4225_s6 + $0x60] sm:$0xff]  ;;  %v1574_v14 = vld [vmem:[%s4225_s6 + $0x68] sm:$0xff] }
 0x142   : > { %2675 = vmatprep.mubr.f32.mxu1 %v1020_v62  ;;  %v1014_v44 = vmax.f32 %v1006_v43, 0.0  ;;  %v967_v26 = vadd.f32 %v959_v21, %v938_v61  ;;  %v988_v4 = vmul.f32 %v3366_v12, %v916_v56  ;;  %v2840_v52 = vpack.c.bf16 %v1562_v50, %v1561_v37  ;;  %v1575_v16 = vld [vmem:[%s4225_s6 + $0x70] sm:$0xff]  ;;  %v1576_v62 = vld [vmem:[%s4225_s6 + $0x78] sm:$0xff]  ;;  %v3645_v37 = vld [vmem:[%s4224_s5 + $0x7] ss:$0 sm:$0xff] }
 0x143   : > { %v1021_v17 = vmin.f32 %v1013_v59, 6.0  ;;  %v1007_v49 = vadd.f32 %v3486_v24, %v994_v29  ;;  %v995_v31 = vadd.f32 %v987_v48, %v966_v0  ;;  %v2848_v40 = vpack.c.bf16 %v1566_v55, %v1565_v57  ;;  %v2411_v61 = vld [vmem:[%s4223_s4 + $0x10] sm:$0xff]  ;;  %v2412_v21 = vld [vmem:[%s4223_s4 + $0x18] sm:$0xff]  ;;  %v2391_v29 = vld [vmem:[%s4226_s7 + $0x3] ss:$0 sm:$0xff] }
 0x144   : > { %v1022_v22 = vmin.f32 %v1014_v44, 6.0  ;;  %v996_v30 = vadd.f32 %v988_v4, %v967_v26  ;;  %2841 = vmatprep.subr.bf16.mxu0 %v2840_v52  ;;  %v2852_v36 = vpack.c.bf16 %v1568_v23, %v1567_v5  ;;  %v2856_v51 = vpack.c.bf16 %v1570_v34, %v1569_v45  ;;  %v3650_v50 = vld [vmem:[%s4224_s5 + $0x2] ss:$0 sm:$0xff] }
 0x145   : > { %2676 = vmatmul.mubr.f32.gmra.mrb[2].mxu1 %v1021_v17  ;;  %v1015_v7 = vmax.f32 %v1007_v49, 0.0  ;;  %v1008_v60 = vadd.f32 %v3486_v24, %v995_v31  ;;  %2843 = vmatpush3.bf16.msra.mxu0 %v2840_v52  ;;  %v2860_v18 = vpack.c.bf16 %v1572_v38, %v1571_v6  ;;  %v2864_v15 = vpack.c.bf16 %v1574_v14, %v1573_v8  ;;  %v3697_v38 = vld [vmem:[%s4224_s5 + $0x5] ss:$0 sm:$0xff] }
 0x146   : > { %2678 = vmatprep.mubr.f32.mxu1 %v1022_v22  ;;  %v1009_v10 = vadd.f32 %v3486_v24, %v996_v30  ;;  %v1563_v24 = vld [vmem:[%s4225_s6 + $0x10] sm:$0xff]  ;;  %v2868_v43 = vpack.c.bf16 %v1576_v62, %v1575_v16  ;;  %v3617_v59 = vpack.c.bf16 %v2412_v21, %v2411_v61 }
 0x147   : > { %v1023_v11 = vmin.f32 %v1015_v7, 6.0  ;;  %v1016_v33 = vmax.f32 %v1008_v60, 0.0  ;;  %v2844_v13 = vpack.c.bf16 %v1564_v28, %v1563_v24  ;;  %v3626_v60 = vld [vmem:[%s4224_s5] ss:$0 sm:$0xff] }
 0x148   : > { %v1017_v19 = vmax.f32 %v1009_v10, 0.0  ;;  %v3628_v10 = vld [vmem:[#allocation2 + $0x9] sm:$0xff]  ;;  %v1328_v28 = vmul.f32 %v3626_v60, %v3339_v63 }
 0x149   : > { %2679 = vmatmul.mubr.f32.gmra.mrb[4].mxu1 %v1023_v11  ;;  %v1024_v32 = vmin.f32 %v1016_v33, 6.0  ;;  %2845 = vmatprep.subr.bf16.mxu0 %v2844_v13  ;;  %4249 = vst [vmem:[#allocation14_spill] sm:$0xff] %v3628_v10  ;;  %v3633_v33 = vld [vmem:[%s4224_s5 + $0x1] ss:$0 sm:$0xff]  ;;  %v3664_v55 = vmul.f32 %v3650_v50, %v3628_v10 }
 0x14a   : > { %v1025_v12 = vmin.f32 %v1017_v19, 6.0  ;;  %2847 = vmatpush3.bf16.msra.mxu0 %v2844_v13  ;;  %v3638_v19 = vld [vmem:[%s4224_s5 + $0x4] ss:$0 sm:$0xff]  ;;  %v3657_v13 = vld [vmem:[%s4224_s5 + $0x6] ss:$0 sm:$0xff]  ;;  %v3660_v57 = vmul.f32 0.0, %v3633_v33 }
 0x14b   : > { %2681 = vmatprep.mubr.f32.mxu1 %v1024_v32  ;;  %2849 = vmatprep.subr.bf16.mxu0 %v2848_v40  ;;  %v3640_v32 = vld [vmem:[#allocation2 + $0xdf] sm:$0xff] }
 0x14c   : > { %4250 = vst [vmem:[#allocation15_spill] sm:$0xff] %v3640_v32  ;;  %v3671_v63 = vmul.f32 %v3657_v13, %v3640_v32 }
 0x14d   : > { %2682 = vmatmul.mubr.f32.gmra.mrb[6].mxu1 %v1025_v12 }
 0x14e   : > { %2851 = vmatpush3.bf16.msra.mxu0 %v2848_v40 }
 0x14f   : > { %2853 = vmatprep.subr.bf16.mxu0 %v2852_v36 }
 0x152   : > { %2855 = vmatpush3.bf16.msra.mxu0 %v2852_v36 }
 0x153   : > { %2857 = vmatprep.subr.bf16.mxu0 %v2856_v51 }
 0x156   : > { %2859 = vmatpush3.bf16.msra.mxu0 %v2856_v51 }
 0x157   : > { %2861 = vmatprep.subr.bf16.mxu0 %v2860_v18 }
 0x15a   : > { %2863 = vmatpush3.bf16.msra.mxu0 %v2860_v18 }
 0x15b   : > { %2865 = vmatprep.subr.bf16.mxu0 %v2864_v15 }
 0x15e   : > { %2867 = vmatpush3.bf16.msra.mxu0 %v2864_v15 }
 0x15f   : > { %2869 = vmatprep.subr.bf16.mxu0 %v2868_v43 }
 0x162   : > { %2871 = vmatpush3.bf16.msra.mxu0 %v2868_v43 }
 0x163   : > { %2873 = vmatprep.subr.bf16.mxu0 %v3617_v59 }
 0x212   : > { %v2674_v41 = vpop.f32.mrb[0].mxu1 }
 0x213   : > { %v1113_v2 = vpop.f32.mrb[1].mxu1  ;;  %v3551_v53 = vadd.f32 %v2674_v41, %v2390_v20 }
 0x214   : > { %v3549_v47 = vadd.f32 %v2390_v20, %v1113_v2 }
 0x215   : > { %4242 = vst [vmem:[#allocation7_spill] sm:$0xff] %v3551_v53 }
 0x216   : > { %4241 = vst [vmem:[#allocation6_spill] sm:$0xff] %v3549_v47  ;;  %2688 = vmatprep.mubr.msk.f32.mxu1 %vm1159_vm1, %v3549_v47 }
 0x217   : > { %2689 = vmatmul.mubr.msk.f32.vlgmr.msra.gmra.mrb[8].mxu1 %vm1159_vm1, %v3551_v53 }
 0x218   : > { %v2677_v35 = vpop.f32.mrb[2].mxu1 }
 0x219   : > { %v1123_v54 = vpop.f32.mrb[3].mxu1  ;;  %v3559_v9 = vadd.f32 %v2677_v35, %v2390_v20 }
 0x21a   : > { %v3557_v42 = vadd.f32 %v2390_v20, %v1123_v54 }
 0x21b   : > { %4244 = vst [vmem:[#allocation9_spill] sm:$0xff] %v3559_v9 }
 0x21c   : > { %4243 = vst [vmem:[#allocation8_spill] sm:$0xff] %v3557_v42  ;;  %v2680_v58 = vpop.f32.mrb[4].mxu1  ;;  %2691 = vmatprep.mubr.msk.f32.mxu1 %vm1159_vm1, %v3557_v42 }
 0x21d   : > { %v1133_v27 = vpop.f32.mrb[5].mxu1  ;;  %2692 = vmatmul.mubr.msk.f32.gmra.mrb[10].mxu1 %vm1159_vm1, %v3559_v9  ;;  %v3567_v56 = vadd.f32 %v2680_v58, %v2390_v20  ;;  %v3676_v58 = vld [vmem:[%s4224_s5 + $0x3] ss:$0 sm:$0xff] }
 0x21e   : > { %v3565_v46 = vadd.f32 %v2390_v20, %v1133_v27 }
 0x21f   : > { %4246 = vst [vmem:[#allocation11_spill] sm:$0xff] %v3567_v56 }
 0x220   : > { %4245 = vst [vmem:[#allocation10_spill] sm:$0xff] %v3565_v46  ;;  %v2683_v3 = vpop.f32.mrb[6].mxu1  ;;  %2694 = vmatprep.mubr.msk.f32.mxu1 %vm1159_vm1, %v3565_v46 }
 0x221   : > { %v1143_v25 = vpop.f32.mrb[7].mxu1  ;;  %2695 = vmatmul.mubr.msk.f32.gmra.mrb[12].mxu1 %vm1159_vm1, %v3567_v56  ;;  %v3575_v1 = vadd.f32 %v2683_v3, %v2390_v20 }
 0x222   : > { %v3573_v39 = vadd.f32 %v2390_v20, %v1143_v25 }
 0x223   : > { %4248 = vst [vmem:[#allocation13_spill] sm:$0xff] %v3575_v1 }
 0x224   : > { %4247 = vst [vmem:[#allocation12_spill] sm:$0xff] %v3573_v39  ;;  %2697 = vmatprep.mubr.msk.f32.mxu1 %vm1159_vm1, %v3573_v39 }
 0x225   : > { %2698 = vmatmul.mubr.msk.f32.gmra.mrb[14].mxu1 %vm1159_vm1, %v3575_v1 }
 0x2ea   : > { %v2690_v0 = vpop.f32.mrb[8].mxu1 }
 0x2eb   : > { %v1256_v48 = vadd.f32 %v2690_v0, %v2391_v29  ;;  %v1250_v44 = vpop.f32.mrb[9].mxu1 }
 0x2ec   : > { %v1251_v26 = vadd.f32 %v2391_v29, %v1250_v44 }
 0x2ed   : > { %v1290_v4 = vmax.f32 %v1256_v48, 0.0 }
 0x2ee   : > { %v1289_v17 = vmax.f32 %v1251_v26, 0.0 }
 0x2ef   : > { %v1298_v49 = vmin.f32 %v1290_v4, 6.0 }
 0x2f0   : > { %v1297_v31 = vmin.f32 %v1289_v17, 6.0  ;;  %v2693_v22 = vpop.f32.mrb[10].mxu1  ;;  %v3718_v17 = vld [vmem:[%s4224_s5 + $0x8] ss:$0 sm:$0xff] }
 0x2f1   : > { %1306 = vst [vmem:[#allocation2 + $0x38] sm:$0xff] %v1298_v49  ;;  %v1266_v30 = vadd.f32 %v2693_v22, %v2391_v29  ;;  %v1260_v7 = vpop.f32.mrb[11].mxu1  ;;  %v3667_v2 = vmul.f32 %v3638_v19, %v1298_v49  ;;  %v3679_v27 = vmul.f32 %v3645_v37, %v1298_v49  ;;  %v3682_v3 = vmul.f32 %v3633_v33, %v1298_v49 }
 0x2f2   : > { %1305 = vst [vmem:[#allocation2 + $0x20] sm:$0xff] %v1297_v31  ;;  %v1261_v11 = vadd.f32 %v2391_v29, %v1260_v7  ;;  %v3685_v5 = vmul.f32 %v3633_v33, %v1297_v31  ;;  %v1422_v23 = vmul.f32 %v3638_v19, %v1297_v31 }
 0x2f3   : > { %v1292_v12 = vmax.f32 %v1266_v30, 0.0 }
 0x2f4   : > { %v1291_v24 = vmax.f32 %v1261_v11, 0.0  ;;  %v2696_v52 = vpop.f32.mrb[12].mxu1 }
 0x2f5   : > { %v1300_v40 = vmin.f32 %v1292_v12, 6.0  ;;  %v1276_v20 = vadd.f32 %v2696_v52, %v2391_v29  ;;  %v1270_v41 = vpop.f32.mrb[13].mxu1 }
 0x2f6   : > { %v1299_v35 = vmin.f32 %v1291_v24, 6.0  ;;  %v1271_v54 = vadd.f32 %v2391_v29, %v1270_v41 }
 0x2f7   : > { %1308 = vst [vmem:[#allocation2 + $0x68] sm:$0xff] %v1300_v40  ;;  %v1294_v25 = vmax.f32 %v1276_v20, 0.0  ;;  %v3689_v36 = vmul.f32 %v3645_v37, %v1300_v40  ;;  %v3700_v8 = vmul.f32 %v3638_v19, %v1300_v40  ;;  %v3703_v18 = vmul.f32 %v3633_v33, %v1300_v40 }
 0x2f8   : > { %1307 = vst [vmem:[#allocation2 + $0x50] sm:$0xff] %v1299_v35  ;;  %v1293_v45 = vmax.f32 %v1271_v54, 0.0  ;;  %v2699_v34 = vpop.f32.mrb[14].mxu1  ;;  %v1315_v51 = vld [vmem:[#allocation2 + $0x37] sm:$0xff]  ;;  %v3692_v6 = vmul.f32 %v3645_v37, %v1299_v35  ;;  %v3709_v0 = vmul.f32 %v3638_v19, %v1299_v35  ;;  %v3726_v30 = vmul.f32 %v3633_v33, %v1299_v35 }
 0x2f9   : > { %v3705_v14 = vmin.f32 %v1294_v25, 6.0  ;;  %v1286_v15 = vadd.f32 %v2699_v34, %v2391_v29  ;;  %v1280_v16 = vpop.f32.mrb[15].mxu1  ;;  %v1314_v62 = vld [vmem:[#allocation2 + $0x1f] sm:$0xff]  ;;  %v1350_v43 = vmul.f32 %v3676_v58, %v1315_v51  ;;  %v1370_v31 = vmul.f32 %v3657_v13, %v1315_v51 }
 0x2fa   : > { %v1460_v61 = vld [vmem:[#allocation2 + $0x21] sm:$0xff]  ;;  %v1461_v21 = vld [vmem:[#allocation2 + $0x39] sm:$0xff]  ;;  %v3711_v48 = vmin.f32 %v1293_v45, 6.0  ;;  %v1281_v44 = vadd.f32 %v2391_v29, %v1280_v16  ;;  %v1329_v26 = vmul.f32 %v3626_v60, %v1314_v62  ;;  %v1349_v4 = vmul.f32 %v3676_v58, %v1314_v62 }
 0x2fb   : > { %1310 = vst [vmem:[#allocation2 + $0x98] sm:$0xff] %v3705_v14  ;;  %v1296_v49 = vmax.f32 %v1286_v15, 0.0  ;;  %v3723_v22 = vmul.f32 %v3650_v50, %v1460_v61  ;;  %v1495_v11 = vmul.f32 %v3697_v38, %v1460_v61  ;;  %v3731_v12 = vmul.f32 %v3697_v38, %v1461_v21 }
 0x2fc   : > { %1309 = vst [vmem:[#allocation2 + $0x80] sm:$0xff] %v3711_v48  ;;  %v1295_v29 = vmax.f32 %v1281_v44, 0.0  ;;  %v1357_v7 = vadd.f32 %v1349_v4, %v1328_v28  ;;  %v1358_v52 = vadd.f32 %v1350_v43, %v1329_v26  ;;  %v3736_v40 = vmul.f32 %v3718_v17, %v1461_v21 }
 0x2fd   : > { %v3733_v24 = vmin.f32 %v1296_v49, 6.0  ;;  %v1330_v20 = vmul.f32 %v3626_v60, %v1315_v51  ;;  %v3742_v28 = vmul.f32 %v3650_v50, %v1461_v21  ;;  %v3746_v45 = vmul.f32 %v3645_v37, %v3711_v48 }
 0x2fe   : > { %v3739_v41 = vmin.f32 %v1295_v29, 6.0  ;;  %v1378_v35 = vadd.f32 %v1370_v31, %v1357_v7  ;;  %v1317_v54 = vld [vmem:[#allocation2 + $0x67] sm:$0xff]  ;;  %v1426_v62 = vmul.f32 %v3638_v19, %v3711_v48  ;;  %v3755_v43 = vmul.f32 %v3645_v37, %v3705_v14 }
 0x2ff   : > { %v1463_v25 = vld [vmem:[#allocation2 + $0x69] sm:$0xff]  ;;  %1312 = vst [vmem:[#allocation2 + $0xc8] sm:$0xff] %v3733_v24  ;;  %v1462_v15 = vld [vmem:[#allocation2 + $0x51] sm:$0xff]  ;;  %v1372_v16 = vmul.f32 %v3657_v13, %v1317_v54  ;;  %v1352_v51 = vmul.f32 %v3676_v58, %v1317_v54  ;;  %v1332_v56 = vmul.f32 %v3626_v60, %v1317_v54 }
 0x300   : > { %v1316_v34 = vld [vmem:[#allocation2 + $0x4f] sm:$0xff]  ;;  %1311 = vst [vmem:[#allocation2 + $0xb0] sm:$0xff] %v3739_v41  ;;  %v1409_v21 = vadd.f32 %v3660_v57, %v1378_v35  ;;  %v3762_v26 = vmul.f32 %v3718_v17, %v1463_v25  ;;  %v1517_v4 = vmul.f32 %v3718_v17, %v1462_v15  ;;  %v1497_v49 = vmul.f32 %v3697_v38, %v1462_v15 }
 0x301   : > { %v1371_v61 = vmul.f32 %v3657_v13, %v1316_v34  ;;  %v1351_v44 = vmul.f32 %v3676_v58, %v1316_v34  ;;  %v1331_v31 = vmul.f32 %v3626_v60, %v1316_v34  ;;  %v3768_v29 = vmul.f32 %v3697_v38, %v1463_v25 }
 0x302   : > { %v1430_v32 = vadd.f32 %v1422_v23, %v1409_v21  ;;  %v1477_v39 = vmul.f32 %v3650_v50, %v1462_v15  ;;  %v1319_v57 = vld [vmem:[#allocation2 + $0x97] sm:$0xff]  ;;  %v1478_v42 = vmul.f32 %v3650_v50, %v1463_v25 }
 0x303   : > { %v1379_v7 = vadd.f32 %v1371_v61, %v1358_v52  ;;  %v1359_v10 = vadd.f32 %v1351_v44, %v1330_v20  ;;  %v3771_v35 = vld [vmem:[#allocation2 + $0x99] sm:$0xff]  ;;  %v1360_v46 = vadd.f32 %v1352_v51, %v1331_v31  ;;  %v1354_v9 = vmul.f32 %v3676_v58, %v1319_v57  ;;  %v1464_v20 = vld [vmem:[#allocation2 + $0x81] sm:$0xff] }
 0x304   : > { %v1318_v1 = vld [vmem:[#allocation2 + $0x7f] sm:$0xff]  ;;  %v1451_v47 = vadd.f32 %v3679_v27, %v1430_v32  ;;  %v1374_v61 = vmul.f32 %v3657_v13, %v1319_v57  ;;  %v3783_v51 = vmul.f32 %v3718_v17, %v3771_v35  ;;  %v1519_v27 = vmul.f32 %v3718_v17, %v1464_v20 }
 0x305   : > { %v1410_v34 = vadd.f32 %v3685_v5, %v1379_v7  ;;  %v1380_v52 = vadd.f32 %v1372_v16, %v1359_v10  ;;  %v1373_v23 = vmul.f32 %v3657_v13, %v1318_v1  ;;  %v1353_v15 = vmul.f32 %v3676_v58, %v1318_v1 }
 0x306   : > { %v1333_v54 = vmul.f32 %v3626_v60, %v1318_v1  ;;  %v1482_v5 = vadd.f32 %v3664_v55, %v1451_v47  ;;  %v1499_v21 = vmul.f32 %v3697_v38, %v1464_v20  ;;  %v3799_v47 = vld [vmem:[%s4226_s7 + $0x4] ss:$0 sm:$0xff]  ;;  %v1406_v55 = vmul.f32 %v3633_v33, %v3711_v48 }
 0x307   : > { %v1431_v25 = vadd.f32 %v3667_v2, %v1410_v34  ;;  %v1411_v32 = vadd.f32 %v3682_v3, %v1380_v52  ;;  %v1381_v10 = vadd.f32 %v1373_v23, %v1360_v46  ;;  %v1361_v16 = vadd.f32 %v1353_v15, %v1332_v56  ;;  %v3791_v44 = vld [vmem:[#allocation2 + $0xaf] sm:$0xff] }
 0x308   : > { %v1362_v31 = vadd.f32 %v1354_v9, %v1333_v54  ;;  %v1503_v53 = vadd.f32 %v1495_v11, %v1482_v5  ;;  %v1375_v56 = vmul.f32 %v3657_v13, %v3791_v44  ;;  %v1427_v9 = vmul.f32 %v3638_v19, %v3705_v14 }
 0x309   : > { %v1452_v7 = vadd.f32 %v3692_v6, %v1431_v25  ;;  %v1432_v1 = vadd.f32 %v3709_v0, %v1411_v32  ;;  %v1412_v2 = vadd.f32 %v3726_v30, %v1381_v10  ;;  %v1382_v46 = vadd.f32 %v1374_v61, %v1361_v16 }
 0x30a   : > { %v1524_v6 = vadd.f32 %v3736_v40, %v1503_v53  ;;  %v1383_v34 = vadd.f32 %v1375_v56, %v1362_v31  ;;  %v1448_v52 = vmul.f32 %v3645_v37, %v3739_v41  ;;  %v1479_v23 = vmul.f32 %v3650_v50, %v1464_v20  ;;  %v1321_v40 = vld [vmem:[#allocation2 + $0xc7] sm:$0xff] }
 0x30b   : > { %v1483_v3 = vadd.f32 %v3723_v22, %v1452_v7  ;;  %v1453_v0 = vadd.f32 %v3689_v36, %v1432_v1  ;;  %v1433_v30 = vadd.f32 %v3700_v8, %v1412_v2  ;;  %v1413_v11 = vadd.f32 %v3703_v18, %v1382_v46  ;;  %v1466_v1 = vld [vmem:[#allocation2 + $0xb1] sm:$0xff] }
 0x30c   : > { %v1537_v48 = vadd.f32 %v3799_v47, %v1524_v6  ;;  %v1414_v61 = vadd.f32 %v1406_v55, %v1383_v34  ;;  %v1334_v8 = vmul.f32 %v3626_v60, %v1319_v57  ;;  %v1355_v18 = vmul.f32 %v3676_v58, %v3791_v44 }
 0x30d   : > { %v1504_v15 = vadd.f32 %v3731_v12, %v1483_v3  ;;  %v1484_v22 = vadd.f32 %v3742_v28, %v1453_v0  ;;  %v1454_v53 = vadd.f32 %v3746_v45, %v1433_v30  ;;  %v1434_v36 = vadd.f32 %v1426_v62, %v1413_v11 }
 0x30e   : > { %v1545_v54 = vmax.f32 %v1537_v48, 0.0  ;;  %v1435_v10 = vadd.f32 %v1427_v9, %v1414_v61  ;;  %v1363_v12 = vadd.f32 %v1355_v18, %v1334_v8  ;;  %v1376_v28 = vmul.f32 %v3657_v13, %v1321_v40 }
 0x30f   : > { %v1525_v25 = vadd.f32 %v1517_v4, %v1504_v15  ;;  %v1505_v5 = vadd.f32 %v1497_v49, %v1484_v22  ;;  %v1485_v20 = vadd.f32 %v1477_v39, %v1454_v53  ;;  %v1455_v32 = vadd.f32 %v3755_v43, %v1434_v36  ;;  %v1467_v15 = vld [vmem:[#allocation2 + $0xc9] sm:$0xff] }
 0x310   : > { %v1553_v16 = vmin.f32 %v1545_v54, 6.0  ;;  %v1456_v7 = vadd.f32 %v1448_v52, %v1435_v10  ;;  %v1384_v2 = vadd.f32 %v1376_v28, %v1363_v12  ;;  %v1407_v39 = vmul.f32 %v3633_v33, %v3705_v14  ;;  %v3859_v12 = vld [vmem:[#allocation2 + $0xe1] sm:$0xff] }
 0x311   : > { %v1538_v45 = vadd.f32 %v3799_v47, %v1525_v25  ;;  %v1526_v62 = vadd.f32 %v3762_v26, %v1505_v5  ;;  %v1506_v57 = vadd.f32 %v3768_v29, %v1485_v20  ;;  %v1486_v31 = vadd.f32 %v1478_v42, %v1455_v32 }
 0x312   : > { %2732 = vmatprep.mubr.f32.mxu0 %v1553_v16  ;;  %v1500_v13 = vmul.f32 %v3697_v38, %v3771_v35  ;;  %v1487_v56 = vadd.f32 %v1479_v23, %v1456_v7  ;;  %v1415_v26 = vadd.f32 %v1407_v39, %v1384_v2  ;;  %v1428_v42 = vmul.f32 %v3638_v19, %v3739_v41 }
 0x313   : > { %v1546_v43 = vmax.f32 %v1538_v45, 0.0  ;;  %v1539_v4 = vadd.f32 %v3799_v47, %v1526_v62  ;;  %v1527_v49 = vadd.f32 %v1519_v27, %v1506_v57  ;;  %v1507_v46 = vadd.f32 %v1499_v21, %v1486_v31 }
 0x314   : > { %v1521_v14 = vmul.f32 %v3718_v17, %v1466_v1  ;;  %v1508_v6 = vadd.f32 %v1500_v13, %v1487_v56  ;;  %v1436_v0 = vadd.f32 %v1428_v42, %v1415_v26  ;;  %v1449_v27 = vmul.f32 %v3645_v37, %v3733_v24  ;;  %v4253_v56 = vld [vmem:[#allocation9_spill] sm:$0xff]  ;;  %v4254_v42 = vld [vmem:[#allocation8_spill] sm:$0xff] }
 0x315   : > { %v1554_v29 = vmin.f32 %v1546_v43, 6.0  ;;  %v1547_v55 = vmax.f32 %v1539_v4, 0.0  ;;  %v1540_v9 = vadd.f32 %v3799_v47, %v1527_v49  ;;  %v1528_v3 = vadd.f32 %v3783_v51, %v1507_v46  ;;  %v4251_v43 = vld [vmem:[#allocation7_spill] sm:$0xff] }
 0x316   : > { %v1480_v11 = vmul.f32 %v3650_v50, %v3771_v35  ;;  %v1335_v34 = vmul.f32 %v3626_v60, %v3791_v44  ;;  %v1529_v23 = vadd.f32 %v1521_v14, %v1508_v6  ;;  %v1457_v48 = vadd.f32 %v1449_v27, %v1436_v0  ;;  %v4256_v27 = vld [vmem:[#allocation10_spill] sm:$0xff] }
 0x317   : > { %2733 = vmatmul.mubr.f32.vlgmr.msra.gmra.mrb[32].mxu0 %v1554_v29  ;;  %v1555_v21 = vmin.f32 %v1547_v55, 6.0  ;;  %v1548_v30 = vmax.f32 %v1540_v9, 0.0  ;;  %v1541_v52 = vadd.f32 %v3799_v47, %v1528_v3  ;;  %v1356_v51 = vmul.f32 %v3676_v58, %v1321_v40  ;;  %v3852_v40 = vld [vmem:[#allocation2] sm:$0xff]  ;;  %v4255_v3 = vld [vmem:[#allocation11_spill] sm:$0xff] }
 0x318   : > { %2875 = vmatpush3.bf16.msra.mxu0 %v3617_v59  ;;  %v1501_v53 = vmul.f32 %v3697_v38, %v1466_v1  ;;  %v1542_v61 = vadd.f32 %v3799_v47, %v1529_v23  ;;  %v1488_v35 = vadd.f32 %v1480_v11, %v1457_v48  ;;  %v1522_v60 = vmul.f32 %v3718_v17, %v1467_v15 }
 0x319   : > { %2735 = vmatprep.mubr.f32.mxu0 %v1555_v21  ;;  %v1556_v22 = vmin.f32 %v1548_v30, 6.0  ;;  %v1549_v36 = vmax.f32 %v1541_v52, 0.0  ;;  %v1364_v8 = vadd.f32 %v1356_v51, %v1335_v34  ;;  %v1408_v44 = vmul.f32 %v3633_v33, %v3739_v41  ;;  %v4257_v52 = vld [vmem:[#allocation13_spill] sm:$0xff] }
 0x31a   : > { %v1550_v54 = vmax.f32 %v1542_v61, 0.0  ;;  %v1509_v58 = vadd.f32 %v1501_v53, %v1488_v35  ;;  %v1450_v25 = vmul.f32 %v3852_v40, %v3645_v37  ;;  %v1429_v10 = vmul.f32 %v3638_v19, %v3733_v24  ;;  %v2442_v61 = vld [vmem:[%s4225_s6 + $0x88] sm:$0xff] }
 0x31b   : > { %2736 = vmatmul.mubr.f32.gmra.mrb[34].mxu0 %v1556_v22  ;;  %v1557_v18 = vmin.f32 %v1549_v36, 6.0  ;;  %v1385_v59 = vadd.f32 %v3671_v63, %v1364_v8  ;;  %v1481_v16 = vmul.f32 %v3650_v50, %v1466_v1  ;;  %v1502_v37 = vmul.f32 %v3697_v38, %v1467_v15  ;;  %v2410_v50 = vld [vmem:[%s4226_s7 + $0x5] ss:$0 sm:$0xff]  ;;  %v4252_v38 = vld [vmem:[#allocation6_spill] sm:$0xff] }
 0x31c   : > { %v1558_v5 = vmin.f32 %v1550_v54, 6.0  ;;  %v1530_v20 = vadd.f32 %v1522_v60, %v1509_v58  ;;  %v1523_v57 = vmul.f32 %v3718_v17, %v3859_v12  ;;  %v4258_v15 = vld [vmem:[#allocation12_spill] sm:$0xff]  ;;  %v2443_v8 = vld [vmem:[%s4225_s6 + $0x90] sm:$0xff]  ;;  %v2444_v60 = vld [vmem:[%s4225_s6 + $0x98] sm:$0xff] }
 0x31d   : > { %2738 = vmatprep.mubr.f32.mxu0 %v1557_v18  ;;  %v1416_v32 = vadd.f32 %v1408_v44, %v1385_v59  ;;  %v2441_v36 = vld [vmem:[%s4225_s6 + $0x80] sm:$0xff]  ;;  %v2880_v18 = vpack.c.bf16 %v2444_v60, %v2443_v8  ;;  %v2446_v54 = vld [vmem:[%s4225_s6 + $0xa8] sm:$0xff]  ;;  %v2447_v59 = vld [vmem:[%s4225_s6 + $0xb0] sm:$0xff] }
 0x31e   : > { %v1543_v33 = vadd.f32 %v3799_v47, %v1530_v20  ;;  %v2876_v35 = vpack.c.bf16 %v2442_v61, %v2441_v36  ;;  %v2445_v44 = vld [vmem:[%s4225_s6 + $0xa0] sm:$0xff]  ;;  %v3994_v61 = vld [vmem:[%s4224_s5 + $0x11] ss:$0 sm:$0xff] }
 0x31f   : > { %2739 = vmatmul.mubr.f32.gmra.mrb[36].mxu0 %v1558_v5  ;;  %v1437_v41 = vadd.f32 %v1429_v10, %v1416_v32  ;;  %v2884_v58 = vpack.c.bf16 %v2446_v54, %v2445_v44  ;;  %v2449_v20 = vld [vmem:[%s4225_s6 + $0xc0] sm:$0xff]  ;;  %v2450_v32 = vld [vmem:[%s4225_s6 + $0xc8] sm:$0xff]  ;;  %v4006_v44 = vld [vmem:[%s4224_s5 + $0x16] ss:$0 sm:$0xff] }
 0x320   : > { %v1551_v28 = vmax.f32 %v1543_v33, 0.0  ;;  %2877 = vmatprep.subr.bf16.mxu1 %v2876_v35  ;;  %v2892_v10 = vpack.c.bf16 %v2450_v32, %v2449_v20  ;;  %v2451_v33 = vld [vmem:[%s4225_s6 + $0xd0] sm:$0xff] }
 0x321   : > { %v1458_v63 = vadd.f32 %v1450_v25, %v1437_v41  ;;  %2879 = vmatpush3.bf16.msra.mxu1 %v2876_v35  ;;  %v2448_v25 = vld [vmem:[%s4225_s6 + $0xb8] sm:$0xff]  ;;  %v3999_v35 = vld [vmem:[%s4224_s5 + $0x12] ss:$0 sm:$0xff] }
 0x322   : > { %v1559_v45 = vmin.f32 %v1551_v28, 6.0  ;;  %2881 = vmatprep.subr.bf16.mxu1 %v2880_v18  ;;  %v2888_v5 = vpack.c.bf16 %v2448_v25, %v2447_v59  ;;  %v2452_v41 = vld [vmem:[%s4225_s6 + $0xd8] sm:$0xff] }
 0x323   : > { %v1489_v62 = vadd.f32 %v1481_v16, %v1458_v63  ;;  %v2896_v28 = vpack.c.bf16 %v2452_v41, %v2451_v33  ;;  %v2453_v63 = vld [vmem:[%s4225_s6 + $0xe0] sm:$0xff]  ;;  %v2454_v16 = vld [vmem:[%s4225_s6 + $0xe8] sm:$0xff]  ;;  %v4026_v41 = vld [vmem:[%s4224_s5 + $0x15] ss:$0 sm:$0xff] }
 0x324   : > { %2741 = vmatprep.mubr.f32.mxu0 %v1559_v45  ;;  %v2900_v45 = vpack.c.bf16 %v2454_v16, %v2453_v63 }
 0x325   : > { %v1510_v31 = vadd.f32 %v1502_v37, %v1489_v62  ;;  %2883 = vmatpush3.bf16.msra.mxu1 %v2880_v18  ;;  %v2455_v62 = vld [vmem:[%s4225_s6 + $0xf0] sm:$0xff]  ;;  %v2456_v37 = vld [vmem:[%s4225_s6 + $0xf8] sm:$0xff]  ;;  %v1953_v18 = vmul.f32 %v3852_v40, %v3994_v61 }
 0x326   : > { %2885 = vmatprep.subr.bf16.mxu1 %v2884_v58 }
 0x327   : > { %v1531_v19 = vadd.f32 %v1523_v57, %v1510_v31  ;;  %v2904_v57 = vpack.c.bf16 %v2456_v37, %v2455_v62  ;;  %v3960_v31 = vld [vmem:[%s4226_s7 + $0x6] ss:$0 sm:$0xff] }
 0x329   : > { %v1544_v24 = vadd.f32 %v3799_v47, %v1531_v19  ;;  %2887 = vmatpush3.bf16.msra.mxu1 %v2884_v58  ;;  %v4260_v58 = vld [vmem:[#allocation14_spill] sm:$0xff] }
 0x32a   : > { %2889 = vmatprep.subr.bf16.mxu1 %v2888_v5  ;;  %v4013_v59 = vmul.f32 %v3999_v35, %v4260_v58 }
 0x32b   : > { %v1552_v7 = vmax.f32 %v1544_v24, 0.0 }
 0x32d   : > { %v1560_v2 = vmin.f32 %v1552_v7, 6.0  ;;  %2891 = vmatpush3.bf16.msra.mxu1 %v2888_v5 }
 0x32e   : > { %2893 = vmatprep.subr.bf16.mxu1 %v2892_v10 }
 0x32f   : > { %2742 = vmatmul.mubr.f32.gmra.mrb[38].mxu0 %v1560_v2 }
 0x331   : > { %2895 = vmatpush3.bf16.msra.mxu1 %v2892_v10 }
 0x332   : > { %2897 = vmatprep.subr.bf16.mxu1 %v2896_v28 }
 0x335   : > { %2899 = vmatpush3.bf16.msra.mxu1 %v2896_v28 }
 0x336   : > { %2901 = vmatprep.subr.bf16.mxu1 %v2900_v45 }
 0x339   : > { %2903 = vmatpush3.bf16.msra.mxu1 %v2900_v45 }
 0x33a   : > { %2905 = vmatprep.subr.bf16.mxu1 %v2904_v57 }
 0x33d   : > { %2907 = vmatpush3.bf16.msra.mxu1 %v2904_v57 }
 0x3ea   : > { %v2734_v39 = vpop.f32.mrb[32].mxu0 }
 0x3eb   : > { %v1683_v4 = vadd.f32 %v2734_v39, %v4251_v43  ;;  %v1643_v1 = vpop.f32.mrb[33].mxu0 }
 0x3ec   : > { %v1682_v49 = vadd.f32 %v1643_v1, %v4252_v38 }
 0x3ed   : > { %v3873_v46 = vadd.f32 %v2410_v50, %v1683_v4 }
 0x3ee   : > { %v3871_v13 = vadd.f32 %v2410_v50, %v1682_v49  ;;  %v2737_v17 = vpop.f32.mrb[34].mxu0 }
 0x3ef   : > { %v1685_v47 = vadd.f32 %v2737_v17, %v4253_v56  ;;  %v1653_v26 = vpop.f32.mrb[35].mxu0 }
 0x3f0   : > { %v1684_v29 = vadd.f32 %v1653_v26, %v4254_v42  ;;  %2748 = vmatprep.mubr.msk.f32.mxu0 %vm1159_vm1, %v3871_v13 }
 0x3f1   : > { %2749 = vmatmul.mubr.msk.f32.vlgmr.msra.gmra.mrb[40].mxu0 %vm1159_vm1, %v3873_v46  ;;  %v3883_v9 = vadd.f32 %v2410_v50, %v1685_v47 }
 0x3f2   : > { %v3881_v55 = vadd.f32 %v2410_v50, %v1684_v29  ;;  %v2740_v14 = vpop.f32.mrb[36].mxu0 }
 0x3f3   : > { %v1687_v6 = vadd.f32 %v2740_v14, %v4255_v3  ;;  %v1663_v0 = vpop.f32.mrb[37].mxu0 }
 0x3f4   : > { %2751 = vmatprep.mubr.msk.f32.mxu0 %vm1159_vm1, %v3881_v55  ;;  %v1686_v21 = vadd.f32 %v1663_v0, %v4256_v27  ;;  %v1864_v0 = vld [vmem:[#allocation2 + $0x7] sm:$0xff]  ;;  %v3971_v27 = vld [vmem:[%s4224_s5 + $0x10] ss:$0 sm:$0xff] }
 0x3f5   : > { %2752 = vmatmul.mubr.msk.f32.gmra.mrb[42].mxu0 %vm1159_vm1, %v3883_v9  ;;  %v3893_v11 = vadd.f32 %v2410_v50, %v1687_v6  ;;  %v1880_v36 = vmul.f32 %v3971_v27, %v1864_v0 }
 0x3f6   : > { %v3891_v30 = vadd.f32 %v2410_v50, %v1686_v21 }
 0x3f8   : > { %2754 = vmatprep.mubr.msk.f32.mxu0 %vm1159_vm1, %v3891_v30 }
 0x3f9   : > { %2755 = vmatmul.mubr.msk.f32.gmra.mrb[44].mxu0 %vm1159_vm1, %v3893_v11 }
 0x402   : > { %v2743_v34 = vpop.f32.mrb[38].mxu0 }
 0x403   : > { %v1689_v23 = vadd.f32 %v2743_v34, %v4257_v52  ;;  %v1673_v48 = vpop.f32.mrb[39].mxu0  ;;  %v3976_v34 = vld [vmem:[%s4224_s5 + $0x14] ss:$0 sm:$0xff] }
 0x404   : > { %v1688_v51 = vadd.f32 %v1673_v48, %v4258_v15  ;;  %v3986_v48 = vld [vmem:[%s4224_s5 + $0x17] ss:$0 sm:$0xff] }
 0x405   : > { %v3903_v53 = vadd.f32 %v2410_v50, %v1689_v23  ;;  %v3981_v23 = vld [vmem:[%s4224_s5 + $0x13] ss:$0 sm:$0xff] }
 0x406   : > { %v3901_v22 = vadd.f32 %v2410_v50, %v1688_v51 }
 0x408   : > { %4259 = vst [vmem:[#allocation7_spill] sm:$0xff] %v3901_v22  ;;  %2757 = vmatprep.mubr.msk.f32.mxu0 %vm1159_vm1, %v3901_v22 }
 0x409   : > { %2758 = vmatmul.mubr.msk.f32.gmra.mrb[46].mxu0 %vm1159_vm1, %v3903_v53 }
 0x4c4   : > { %v2750_v19 = vpop.f32.mrb[40].mxu0 }
 0x4c5   : > { %v1807_v24 = vadd.f32 %v2750_v19, %v3960_v31  ;;  %v1801_v7 = vpop.f32.mrb[41].mxu0 }
 0x4c6   : > { %v1802_v2 = vadd.f32 %v3960_v31, %v1801_v7 }
 0x4c7   : > { %v1841_v39 = vmax.f32 %v1807_v24, 0.0 }
 0x4c8   : > { %v1840_v43 = vmax.f32 %v1802_v2, 0.0  ;;  %v2753_v4 = vpop.f32.mrb[42].mxu0 }
 0x4c9   : > { %v1849_v50 = vmin.f32 %v1841_v39, 6.0  ;;  %v1817_v1 = vadd.f32 %v2753_v4, %v3960_v31  ;;  %v1811_v38 = vpop.f32.mrb[43].mxu0 }
 0x4ca   : > { %v1848_v49 = vmin.f32 %v1840_v43, 6.0  ;;  %v1812_v17 = vadd.f32 %v3960_v31, %v1811_v38 }
 0x4cb   : > { %1857 = vst [vmem:[#allocation2 + $0x38] sm:$0xff] %v1849_v50  ;;  %v1843_v56 = vmax.f32 %v1817_v1, 0.0  ;;  %v1975_v54 = vmul.f32 %v3976_v34, %v1849_v50  ;;  %v1995_v32 = vmul.f32 %v3986_v48, %v1849_v50  ;;  %v1955_v28 = vmul.f32 %v3994_v61, %v1849_v50 }
 0x4cc   : > { %1856 = vst [vmem:[#allocation2 + $0x20] sm:$0xff] %v1848_v49  ;;  %v1842_v47 = vmax.f32 %v1812_v17, 0.0  ;;  %v2756_v42 = vpop.f32.mrb[44].mxu0  ;;  %v1954_v10 = vmul.f32 %v3994_v61, %v1848_v49  ;;  %v1974_v33 = vmul.f32 %v3976_v34, %v1848_v49  ;;  %v4041_v49 = vld [vmem:[%s4224_s5 + $0x18] ss:$0 sm:$0xff] }
 0x4cd   : > { %v1851_v26 = vmin.f32 %v1843_v56, 6.0  ;;  %v1827_v14 = vadd.f32 %v2756_v42, %v3960_v31  ;;  %v1821_v3 = vpop.f32.mrb[45].mxu0 }
 0x4ce   : > { %v1850_v29 = vmin.f32 %v1842_v47, 6.0  ;;  %v1822_v6 = vadd.f32 %v3960_v31, %v1821_v3 }
 0x4cf   : > { %1859 = vst [vmem:[#allocation2 + $0x68] sm:$0xff] %v1851_v26  ;;  %v1845_v21 = vmax.f32 %v1827_v14, 0.0  ;;  %v1997_v63 = vmul.f32 %v3986_v48, %v1851_v26  ;;  %v1977_v19 = vmul.f32 %v3976_v34, %v1851_v26  ;;  %v1957_v24 = vmul.f32 %v3994_v61, %v1851_v26 }
 0x4d0   : > { %1858 = vst [vmem:[#allocation2 + $0x50] sm:$0xff] %v1850_v29  ;;  %v1844_v52 = vmax.f32 %v1822_v6, 0.0  ;;  %v1996_v2 = vmul.f32 %v3986_v48, %v1850_v29  ;;  %v1976_v43 = vmul.f32 %v3976_v34, %v1850_v29  ;;  %v1956_v4 = vmul.f32 %v3994_v61, %v1850_v29 }
 0x4d1   : > { %v3988_v15 = vmin.f32 %v1845_v21, 6.0 }
 0x4d2   : > { %v1866_v51 = vld [vmem:[#allocation2 + $0x37] sm:$0xff]  ;;  %v4001_v8 = vmin.f32 %v1844_v52, 6.0 }
 0x4d3   : > { %v1865_v60 = vld [vmem:[#allocation2 + $0x1f] sm:$0xff]  ;;  %1861 = vst [vmem:[#allocation2 + $0x98] sm:$0xff] %v3988_v15  ;;  %v1902_v20 = vmul.f32 %v3981_v23, %v1866_v51  ;;  %v1922_v45 = vmul.f32 %v4006_v44, %v1866_v51  ;;  %v1882_v39 = vmul.f32 %v3971_v27, %v1866_v51 }
 0x4d4   : > { %v1881_v25 = vmul.f32 %v3971_v27, %v1865_v60  ;;  %v1901_v5 = vmul.f32 %v3981_v23, %v1865_v60  ;;  %1860 = vst [vmem:[#allocation2 + $0x80] sm:$0xff] %v4001_v8  ;;  %v2012_v62 = vld [vmem:[#allocation2 + $0x21] sm:$0xff]  ;;  %v2013_v37 = vld [vmem:[#allocation2 + $0x39] sm:$0xff]  ;;  %v1998_v51 = vmul.f32 %v3986_v48, %v4001_v8 }
 0x4d5   : > { %v2027_v56 = vmul.f32 %v3999_v35, %v2012_v62  ;;  %v2048_v47 = vmul.f32 %v4026_v41, %v2013_v37  ;;  %v2047_v0 = vmul.f32 %v4026_v41, %v2012_v62  ;;  %v2068_v21 = vmul.f32 %v4041_v49, %v2013_v37 }
 0x4d6   : > { %v1909_v16 = vadd.f32 %v1901_v5, %v1880_v36  ;;  %v1868_v57 = vld [vmem:[#allocation2 + $0x67] sm:$0xff]  ;;  %v1910_v50 = vadd.f32 %v1902_v20, %v1881_v25  ;;  %v2028_v52 = vmul.f32 %v3999_v35, %v2013_v37 }
 0x4d7   : > { %v1867_v7 = vld [vmem:[#allocation2 + $0x4f] sm:$0xff]  ;;  %v1904_v42 = vmul.f32 %v3981_v23, %v1868_v57  ;;  %v1924_v6 = vmul.f32 %v4006_v44, %v1868_v57  ;;  %v1884_v62 = vmul.f32 %v3971_v27, %v1868_v57 }
 0x4d8   : > { %v1923_v1 = vmul.f32 %v4006_v44, %v1867_v7  ;;  %v1930_v38 = vadd.f32 %v1922_v45, %v1909_v16  ;;  %v1903_v17 = vmul.f32 %v3981_v23, %v1867_v7  ;;  %v1883_v26 = vmul.f32 %v3971_v27, %v1867_v7  ;;  %v2014_v57 = vld [vmem:[#allocation2 + $0x51] sm:$0xff] }
 0x4da   : > { %v1931_v29 = vadd.f32 %v1923_v1, %v1910_v50  ;;  %v1961_v14 = vadd.f32 %v1953_v18, %v1930_v38  ;;  %v1911_v3 = vadd.f32 %v1903_v17, %v1882_v39  ;;  %v4054_v5 = vld [vmem:[#allocation2 + $0x97] sm:$0xff]  ;;  %v1978_v18 = vmul.f32 %v3976_v34, %v4001_v8 }
 0x4db   : > { %v1869_v25 = vld [vmem:[#allocation2 + $0x7f] sm:$0xff]  ;;  %v1912_v16 = vadd.f32 %v1904_v42, %v1883_v26 }
 0x4dc   : > { %v1962_v36 = vadd.f32 %v1954_v10, %v1931_v29  ;;  %v1982_v60 = vadd.f32 %v1974_v33, %v1961_v14  ;;  %v1932_v58 = vadd.f32 %v1924_v6, %v1911_v3  ;;  %v2759_v20 = vpop.f32.mrb[46].mxu0  ;;  %v1925_v45 = vmul.f32 %v4006_v44, %v1869_v25 }
 0x4dd   : > { %v1905_v37 = vmul.f32 %v3981_v23, %v1869_v25  ;;  %v1837_v7 = vadd.f32 %v2759_v20, %v3960_v31  ;;  %v1831_v39 = vpop.f32.mrb[47].mxu0  ;;  %v1926_v29 = vmul.f32 %v4006_v44, %v4054_v5 }
 0x4de   : > { %v1983_v10 = vadd.f32 %v1975_v54, %v1962_v36  ;;  %v2003_v33 = vadd.f32 %v1995_v32, %v1982_v60  ;;  %v1963_v50 = vadd.f32 %v1955_v28, %v1932_v58  ;;  %v1832_v1 = vadd.f32 %v3960_v31, %v1831_v39  ;;  %v2015_v60 = vld [vmem:[#allocation2 + $0x69] sm:$0xff] }
 0x4df   : > { %v1933_v38 = vadd.f32 %v1925_v45, %v1912_v16  ;;  %v1913_v17 = vadd.f32 %v1905_v37, %v1884_v62  ;;  %v1847_v26 = vmax.f32 %v1837_v7, 0.0  ;;  %v1999_v54 = vmul.f32 %v3986_v48, %v3988_v15 }
 0x4e0   : > { %v2004_v42 = vadd.f32 %v1996_v2, %v1983_v10  ;;  %v2034_v14 = vadd.f32 %v4013_v59, %v2003_v33  ;;  %v1984_v3 = vadd.f32 %v1976_v43, %v1963_v50  ;;  %v1846_v6 = vmax.f32 %v1832_v1, 0.0  ;;  %v4075_v59 = vld [vmem:[%s4226_s7 + $0x7] ss:$0 sm:$0xff] }
 0x4e1   : > { %v1964_v22 = vadd.f32 %v1956_v4, %v1933_v38  ;;  %v1934_v20 = vadd.f32 %v1926_v29, %v1913_v17  ;;  %v4068_v32 = vmin.f32 %v1847_v26, 6.0  ;;  %v2069_v2 = vmul.f32 %v4041_v49, %v2014_v57  ;;  %v4091_v38 = vld [vmem:[#allocation2 + $0x99] sm:$0xff] }
 0x4e2   : > { %v2035_v31 = vadd.f32 %v2027_v56, %v2004_v42  ;;  %v2055_v28 = vadd.f32 %v2047_v0, %v2034_v14  ;;  %v2005_v36 = vadd.f32 %v1997_v63, %v1984_v3  ;;  %v4070_v58 = vmin.f32 %v1846_v6, 6.0  ;;  %v4080_v63 = vld [vmem:[#allocation2 + $0x81] sm:$0xff] }
 0x4e3   : > { %v1985_v43 = vadd.f32 %v1977_v19, %v1964_v22  ;;  %v1965_v4 = vadd.f32 %v1957_v24, %v1934_v20  ;;  %1863 = vst [vmem:[#allocation2 + $0xc8] sm:$0xff] %v4068_v32  ;;  %v2049_v56 = vmul.f32 %v4026_v41, %v2014_v57  ;;  %v2070_v0 = vmul.f32 %v4041_v49, %v2015_v60 }
 0x4e4   : > { %v2056_v16 = vadd.f32 %v2048_v47, %v2035_v31  ;;  %v2076_v45 = vadd.f32 %v2068_v21, %v2055_v28  ;;  %v2036_v62 = vadd.f32 %v2028_v52, %v2005_v36  ;;  %1862 = vst [vmem:[#allocation2 + $0xb0] sm:$0xff] %v4070_v58  ;;  %v2029_v7 = vmul.f32 %v3999_v35, %v2014_v57 }
 0x4e5   : > { %v2006_v37 = vadd.f32 %v1998_v51, %v1985_v43  ;;  %v1986_v39 = vadd.f32 %v1978_v18, %v1965_v4  ;;  %v2050_v47 = vmul.f32 %v4026_v41, %v2015_v60  ;;  %v2071_v52 = vmul.f32 %v4041_v49, %v4080_v63 }
 0x4e6   : > { %v2089_v22 = vadd.f32 %v4075_v59, %v2076_v45  ;;  %v2077_v19 = vadd.f32 %v2069_v2, %v2056_v16  ;;  %v2057_v24 = vadd.f32 %v2049_v56, %v2036_v62  ;;  %v2030_v33 = vmul.f32 %v3999_v35, %v2015_v60  ;;  %v4261_v2 = vld [vmem:[#allocation15_spill] sm:$0xff] }
 0x4e7   : > { %v2037_v21 = vadd.f32 %v2029_v7, %v2006_v37  ;;  %v2007_v10 = vadd.f32 %v1999_v54, %v1986_v39  ;;  %v2051_v18 = vmul.f32 %v4026_v41, %v4080_v63  ;;  %v1885_v26 = vmul.f32 %v3971_v27, %v1869_v25 }
 0x4e8   : > { %v2097_v50 = vmax.f32 %v2089_v22, 0.0  ;;  %v2090_v1 = vadd.f32 %v4075_v59, %v2077_v19  ;;  %v2078_v51 = vadd.f32 %v2070_v0, %v2057_v24  ;;  %v1906_v42 = vmul.f32 %v3981_v23, %v4054_v5 }
 0x4e9   : > { %v2058_v17 = vadd.f32 %v2050_v47, %v2037_v21  ;;  %v2038_v29 = vadd.f32 %v2030_v33, %v2007_v10  ;;  %v2072_v54 = vmul.f32 %v4041_v49, %v4091_v38  ;;  %v1958_v60 = vmul.f32 %v3994_v61, %v4001_v8 }
 0x4ea   : > { %v2105_v14 = vmin.f32 %v2097_v50, 6.0  ;;  %v2098_v57 = vmax.f32 %v2090_v1, 0.0  ;;  %v2091_v3 = vadd.f32 %v4075_v59, %v2078_v51  ;;  %v1872_v25 = vld [vmem:[#allocation2 + $0xc7] sm:$0xff]  ;;  %v1929_v43 = vmul.f32 %v4006_v44, %v4261_v2 }
 0x4eb   : > { %v2079_v6 = vadd.f32 %v2071_v52, %v2058_v17  ;;  %v2059_v20 = vadd.f32 %v2051_v18, %v2038_v29  ;;  %v1871_v36 = vld [vmem:[#allocation2 + $0xaf] sm:$0xff]  ;;  %v1914_v45 = vadd.f32 %v1906_v42, %v1885_v26  ;;  %v1886_v0 = vmul.f32 %v3971_v27, %v4054_v5 }
 0x4ec   : > { %2792 = vmatprep.mubr.f32.mxu1 %v2105_v14  ;;  %v2106_v31 = vmin.f32 %v2098_v57, 6.0  ;;  %v2099_v28 = vmax.f32 %v2091_v3, 0.0  ;;  %v1927_v62 = vmul.f32 %v4006_v44, %v1871_v36  ;;  %v1907_v37 = vmul.f32 %v3981_v23, %v1871_v36  ;;  %v2018_v3 = vld [vmem:[#allocation2 + $0xb1] sm:$0xff] }
 0x4ed   : > { %v2092_v4 = vadd.f32 %v4075_v59, %v2079_v6  ;;  %v2080_v16 = vadd.f32 %v2072_v54, %v2059_v20  ;;  %v1887_v7 = vmul.f32 %v3971_v27, %v1871_v36  ;;  %v1908_v19 = vmul.f32 %v3981_v23, %v1872_v25 }
 0x4ee   : > { %2793 = vmatmul.mubr.f32.vlgmr.msra.gmra.mrb[16].mxu1 %v2106_v31  ;;  %v2107_v56 = vmin.f32 %v2099_v28, 6.0  ;;  %v1935_v22 = vadd.f32 %v1927_v62, %v1914_v45  ;;  %v1979_v24 = vmul.f32 %v3976_v34, %v3988_v15  ;;  %v1915_v47 = vadd.f32 %v1907_v37, %v1886_v0  ;;  %v2019_v31 = vld [vmem:[#allocation2 + $0xc9] sm:$0xff] }
 0x4ef   : > { %v2100_v8 = vmax.f32 %v2092_v4, 0.0  ;;  %v2093_v39 = vadd.f32 %v4075_v59, %v2080_v16  ;;  %v1928_v21 = vmul.f32 %v4006_v44, %v1872_v25  ;;  %v1916_v33 = vadd.f32 %v1908_v19, %v1887_v7  ;;  %v2457_v19 = vld [vmem:[%s4226_s7 + $0x8] ss:$0 sm:$0xff] }
 0x4f0   : > { %2795 = vmatprep.mubr.f32.mxu1 %v2107_v56  ;;  %v1966_v5 = vadd.f32 %v1958_v60, %v1935_v22  ;;  %v2000_v27 = vmul.f32 %v3986_v48, %v4070_v58  ;;  %v1959_v1 = vmul.f32 %v3994_v61, %v3988_v15  ;;  %v1960_v17 = vmul.f32 %v3994_v61, %v4070_v58 }
 0x4f1   : > { %v2108_v52 = vmin.f32 %v2100_v8, 6.0  ;;  %v2101_v10 = vmax.f32 %v2093_v39, 0.0  ;;  %v1936_v50 = vadd.f32 %v1928_v21, %v1915_v47  ;;  %v1937_v18 = vadd.f32 %v1929_v43, %v1916_v33 }
 0x4f2   : > { %v1987_v51 = vadd.f32 %v1979_v24, %v1966_v5  ;;  %v1980_v44 = vmul.f32 %v3976_v34, %v4070_v58  ;;  %v2002_v26 = vmul.f32 %v3852_v40, %v3986_v48  ;;  %v2031_v14 = vmul.f32 %v3999_v35, %v4080_v63 }
 0x4f3   : > { %2796 = vmatmul.mubr.f32.gmra.mrb[18].mxu1 %v2108_v52  ;;  %v2109_v23 = vmin.f32 %v2101_v10, 6.0  ;;  %v1967_v29 = vadd.f32 %v1959_v1, %v1936_v50  ;;  %v1968_v15 = vadd.f32 %v1960_v17, %v1937_v18  ;;  %v1981_v57 = vmul.f32 %v3976_v34, %v4068_v32 }
 0x4f4   : > { %v2008_v42 = vadd.f32 %v2000_v27, %v1987_v51  ;;  %v2001_v61 = vmul.f32 %v3986_v48, %v4068_v32  ;;  %v2052_v58 = vmul.f32 %v4026_v41, %v4091_v38  ;;  %v2032_v28 = vmul.f32 %v3999_v35, %v4091_v38 }
 0x4f5   : > { %2798 = vmatprep.mubr.f32.mxu1 %v2109_v23  ;;  %v1988_v6 = vadd.f32 %v1980_v44, %v1967_v29  ;;  %v1989_v54 = vadd.f32 %v1981_v57, %v1968_v15  ;;  %v2073_v36 = vmul.f32 %v4041_v49, %v2018_v3  ;;  %v2033_v34 = vmul.f32 %v3999_v35, %v2018_v3  ;;  %v4262_v44 = vld [vmem:[#allocation7_spill] sm:$0xff] }
 0x4f6   : > { %v2039_v20 = vadd.f32 %v2031_v14, %v2008_v42  ;;  %v2053_v2 = vmul.f32 %v4026_v41, %v2018_v3  ;;  %v2054_v43 = vmul.f32 %v4026_v41, %v2019_v31  ;;  %v2075_v4 = vmul.f32 %v4041_v49, %v3859_v12 }
 0x4f7   : > { %v2009_v40 = vadd.f32 %v2001_v61, %v1988_v6  ;;  %v2010_v60 = vadd.f32 %v2002_v26, %v1989_v54  ;;  %v2074_v45 = vmul.f32 %v4041_v49, %v2019_v31 }
 0x4f8   : > { %v2060_v63 = vadd.f32 %v2052_v58, %v2039_v20 }
 0x4f9   : > { %v2040_v25 = vadd.f32 %v2032_v28, %v2009_v40  ;;  %v2041_v32 = vadd.f32 %v2033_v34, %v2010_v60 }
 0x4fa   : > { %v2081_v48 = vadd.f32 %v2073_v36, %v2060_v63 }
 0x4fb   : > { %v2061_v16 = vadd.f32 %v2053_v2, %v2040_v25  ;;  %v2062_v62 = vadd.f32 %v2054_v43, %v2041_v32 }
 0x4fc   : > { %v2094_v38 = vadd.f32 %v4075_v59, %v2081_v48 }
 0x4fd   : > { %v2082_v56 = vadd.f32 %v2074_v45, %v2061_v16  ;;  %v2083_v0 = vadd.f32 %v2075_v4, %v2062_v62 }
 0x4fe   : > { %v2102_v35 = vmax.f32 %v2094_v38, 0.0 }
 0x4ff   : > { %v2095_v37 = vadd.f32 %v4075_v59, %v2082_v56  ;;  %v2096_v8 = vadd.f32 %v4075_v59, %v2083_v0 }
 0x500   : > { %v2110_v7 = vmin.f32 %v2102_v35, 6.0 }
 0x501   : > { %v2103_v41 = vmax.f32 %v2095_v37, 0.0  ;;  %v2104_v39 = vmax.f32 %v2096_v8, 0.0 }
 0x502   : > { %2799 = vmatmul.mubr.f32.gmra.mrb[20].mxu1 %v2110_v7 }
 0x503   : > { %v2111_v12 = vmin.f32 %v2103_v41, 6.0  ;;  %v2112_v22 = vmin.f32 %v2104_v39, 6.0 }
 0x505   : > { %2801 = vmatprep.mubr.f32.mxu1 %v2111_v12 }
 0x506   : > { %2802 = vmatmul.mubr.f32.gmra.mrb[22].mxu1 %v2112_v22 }
 0x5c1   : > { %v2794_v49 = vpop.f32.mrb[16].mxu1 }
 0x5c2   : > { %v2236_v24 = vadd.f32 %v2794_v49, %v3873_v46  ;;  %v2196_v47 = vpop.f32.mrb[17].mxu1 }
 0x5c3   : > { %v2235_v59 = vadd.f32 %v2196_v47, %v3871_v13 }
 0x5c4   : > { %v2249_v21 = vadd.f32 %v2457_v19, %v2236_v24 }
 0x5c5   : > { %v2248_v52 = vadd.f32 %v2457_v19, %v2235_v59 }
 0x5c6   : > { %2257 = vst.msk [vmem:[%s298_s20 + $0x8] sm:$0xff] %vm1159_vm1, %v2249_v21  ;;  %v2797_v10 = vpop.f32.mrb[18].mxu1 }
 0x5c7   : > { %2256 = vst.msk [vmem:[%s298_s20] sm:$0xff] %vm1159_vm1, %v2248_v52  ;;  %v2238_v5 = vadd.f32 %v2797_v10, %v3883_v9  ;;  %v2206_v33 = vpop.f32.mrb[19].mxu1 }
 0x5c8   : > { %v2237_v27 = vadd.f32 %v2206_v33, %v3881_v55 }
 0x5c9   : > { %v2251_v50 = vadd.f32 %v2457_v19, %v2238_v5 }
 0x5ca   : > { %v2250_v1 = vadd.f32 %v2457_v19, %v2237_v27 }
 0x5cb   : > { %2259 = vst.msk [vmem:[%s298_s20 + $0x18] sm:$0xff] %vm1159_vm1, %v2251_v50 }
 0x5cc   : > { %2258 = vst.msk [vmem:[%s298_s20 + $0x10] sm:$0xff] %vm1159_vm1, %v2250_v1 }
 0x5d5   : > { %v2800_v13 = vpop.f32.mrb[20].mxu1 }
 0x5d6   : > { %v2240_v46 = vadd.f32 %v2800_v13, %v3893_v11  ;;  %v2216_v23 = vpop.f32.mrb[21].mxu1 }
 0x5d7   : > { %v2239_v51 = vadd.f32 %v2216_v23, %v3891_v30 }
 0x5d8   : > { %v2253_v18 = vadd.f32 %v2457_v19, %v2240_v46 }
 0x5d9   : > { %v2252_v17 = vadd.f32 %v2457_v19, %v2239_v51  ;;  %v2803_v29 = vpop.f32.mrb[22].mxu1 }
 0x5da   : > { %2261 = vst.msk [vmem:[%s298_s20 + $0x28] sm:$0xff] %vm1159_vm1, %v2253_v18  ;;  %v2242_v55 = vadd.f32 %v2803_v29, %v3903_v53  ;;  %v2226_v9 = vpop.f32.mrb[23].mxu1 }
 0x5db   : > { %2260 = vst.msk [vmem:[%s298_s20 + $0x20] sm:$0xff] %vm1159_vm1, %v2252_v17  ;;  %v2241_v26 = vadd.f32 %v2226_v9, %v4262_v44 }
 0x5dc   : > { %v2255_v11 = vadd.f32 %v2457_v19, %v2242_v55 }
 0x5dd   : > { %v2254_v30 = vadd.f32 %v2457_v19, %v2241_v26 }
 0x5de   : > { %2263 = vst.msk [vmem:[%s298_s20 + $0x38] sm:$0xff] %vm1159_vm1, %v2255_v11 }
 0x5df   : > { %2262 = vst.msk [vmem:[%s298_s20 + $0x30] sm:$0xff] %vm1159_vm1, %v2254_v30 }
 0x5e0   : > { %2964 = shalt.err (!%p2961_p3)
}
 0x5e1   : > { %s2965_s13 = scalar_lea.hbm %s4170_s25, 1024  ;;  %s2969_s20 = scalar_lea.hbm %s4227_s8, 2048 }
 0x5e2   : > { %p2966_p4 = scmp.ne.s32.totalorder %s4170_s25, %s2965_s13  ;;  %p2970_p9 = scmp.lt.u32.totalorder %s4170_s25, %s4227_s8 }
 0x5e3   : > { %p2971_p10 = scmp.lt.u32.totalorder %s2969_s20, %s2965_s13  ;;  %p2973_p12 = scmp.lt.u32.totalorder %s2965_s13, %s4170_s25 }
 0x5e4   : > { %p2967_p7 = pnand %p2966_p4, %p3102_p5 }
 0x5e5   : > { %p2972_p11 = por %p2971_p10, %p2970_p9 }
 0x5e6   : > { %p2968_p8 = pneg %p2967_p7 }
 0x5e7   : > { %p2974_p13 = por %p2973_p12, %p2972_p11 }
 0x5e9   : > { %p2975_p0 = pnand %p2974_p13, %p2968_p8 }
 0x5eb   : > { %2978 = shalt.err (!%p2975_p0)
}
 0x5ec   : > { %s3017_s24 = smov 128   ;;  %s3018_s26 = smov 8  }
 0x5ed   : > { %2908 = dma.vmem_to_hbm [thread:$0]  (%p3102_p5), %s4172_s22, 1024, %s4170_s25, %s4178_s9, %s3017_s24, %s3017_s24, %s3018_s26  }
 0x5ee PF: > { %p2914_p1 = scmp.ge.s32.totalorder %s3013_s30, 2  ;;  %s2293_s10 = sand.u32 1, %s3001_s27  }
 0x5ef   : > { %s2294_s12 = scalar_lea.sflag [#allocation4], %s2293_s10 }
 0x5f0   : > { %p2911_p2 = pnand %p2914_p1, %p3106_p6 }
 0x5f2   : > { %2996 = dma.done.wait (!%p2911_p2), %s2294_s12, 1024  }
 0x5f3   : > { %2998 = vsyncadd (!%p2911_p2), %s2294_s12, 4294966272  ;;  %p18_p3 = scmp.ge.s32.totalorder %s3089_s11, 4   ;;  %s4263_s27 = smov %s3005_s28 }
 0x5f4   : > { %s4264_s28 = smov %s3009_s29  ;;  %s4265_s29 = smov %s3100_s14 }
 0x5f5   : > { %s4266_s30 = smov %s3089_s11  ;;  %20 = sbr.rel (!%p18_p3) target bundleno = 3 (0x3), region = 92 }
 0x5fc   :  { %2299 = vsyncpa [#allocation4], 1 }
 0x5fd   :  { %2301 = vsyncpa [#allocation4 + $0x1], 1 }

</bundles_post_ra>
